<compile_context>
chip_gen: v7x
topology: tpu7x:2x2x1
jax: 0.10.0
libtpu: 0.0.40
codegen_flags: <defaults>
</compile_context>

<pallas_src>
import functools

import jax
import jax.numpy as jnp
from jax.experimental import pallas as pl
from jax.experimental.pallas import tpu as pltpu


def _round_up(v, m):
    return (v + m - 1) // m * m


# ----------------------------------------------------------------------------
# Fused per-batch kernel: 2x2 maxpool -> conv3x3+ReLU -> conv3x3+ReLU
# ----------------------------------------------------------------------------
def _fused_unet_left_kernel(Hp, Wp, Cin, Cmid,
                            x_ref, w1_ref, b1_ref, w2_ref, b2_ref, o_ref,
                            pad1_ref, im1_ref, pad2_ref, im2_ref):
    # x_ref : (1, 4, Hp, Wp, Cin)   pool-window elements on a leading axis
    # w1_ref: (9*Cin, Cmid)         b1_ref: (1, Cmid)
    # w2_ref: (9*Cmid, Cout_pad)    b2_ref: (1, Cout_pad)
    # o_ref : (1, Hp*Wp, Cout_pad)  lane-dense output
    # pad*_ref: (Hp+2, Wp+2, C)     zero-padded halo scratch (VMEM)
    # im*_ref : (Hp, Wp, 9*C)       im2col scratch (VMEM)

    # ---- 2x2 max pool: elementwise max over the 4 window elements (VPU).
    pooled = jnp.maximum(jnp.maximum(x_ref[0, 0], x_ref[0, 1]),
                         jnp.maximum(x_ref[0, 2], x_ref[0, 3]))  # (Hp, Wp, Cin)

    def conv3x3_relu(src_hwc, pad_ref, im_ref, w_ref, b_ref, cin):
        # "same" zero padding via a VMEM halo scratch.
        pad_ref[...] = jnp.zeros_like(pad_ref)
        pad_ref[1:Hp + 1, 1:Wp + 1, :] = src_hwc
        # Build the im2col matrix in VMEM, then ONE fused K=9*cin MXU matmul.
        for kh in range(3):
            for kw in range(3):
                t = kh * 3 + kw
                im_ref[:, :, t * cin:(t + 1) * cin] = (
                    pad_ref[kh:kh + Hp, kw:kw + Wp, :])
        taps = im_ref[...].reshape(Hp * Wp, 9 * cin)
        acc = jnp.dot(taps, w_ref[...],
                      preferred_element_type=jnp.float32)       # (Hp*Wp, n_out)
        acc = acc + b_ref[...].astype(jnp.float32)
        return jnp.maximum(acc, 0.0)

    h1 = conv3x3_relu(pooled, pad1_ref, im1_ref, w1_ref, b1_ref, Cin)
    h2 = conv3x3_relu(h1.reshape(Hp, Wp, Cmid), pad2_ref, im2_ref,
                      w2_ref, b2_ref, Cmid)
    o_ref[0] = h2.astype(o_ref.dtype)


# ----------------------------------------------------------------------------
# Wrapper: layout prep (one XLA transpose in, one out) + pallas_call
# ----------------------------------------------------------------------------
def unet_left_forward(x_nchw, params):
    N, Cin, H, W = x_nchw.shape
    Hp, Wp = H // 2, W // 2
    # PyTorch MaxPool2d(2) floors odd spatial dims: crop to even explicitly.
    x_nchw = x_nchw[:, :, :2 * Hp, :2 * Wp]

    Cmid = params["w1"].shape[0]          # conv1 output channels
    Cout = params["w2"].shape[0]          # conv2 output channels
    Cout_pad = _round_up(Cout, 128)       # lane-dense output store

    # Single XLA transpose: folds NCHW->NHWC AND splits the 2x2 pool window
    # onto a leading axis (no strided views, no 9x im2col in HBM).
    x6 = x_nchw.reshape(N, Cin, Hp, 2, Wp, 2)
    x_pool = jnp.transpose(x6, (0, 3, 5, 2, 4, 1)).reshape(N, 4, Hp, Wp, Cin)

    # Weights: OIHW -> (kh, kw, in, out) -> (9*in, out). Pad conv2's output
    # channels to a full 128 lanes (sliced off after the kernel).
    w1 = jnp.transpose(params["w1"], (2, 3, 1, 0)).reshape(9 * Cin, Cmid)
    b1 = params["b1"].reshape(1, Cmid)
    w2 = jnp.transpose(params["w2"], (2, 3, 1, 0)).reshape(9 * Cmid, Cout)
    w2 = jnp.pad(w2, ((0, 0), (0, Cout_pad - Cout)))
    b2 = jnp.pad(params["b2"].reshape(1, Cout), ((0, 0), (0, Cout_pad - Cout)))

    kernel = functools.partial(_fused_unet_left_kernel, Hp, Wp, Cin, Cmid)

    out = pl.pallas_call(
        kernel,
        out_shape=jax.ShapeDtypeStruct((N, Hp * Wp, Cout_pad), x_nchw.dtype),
        grid_spec=pltpu.PrefetchScalarGridSpec(
            num_scalar_prefetch=0,
            grid=(N,),
            in_specs=[
                pl.BlockSpec((1, 4, Hp, Wp, Cin), lambda n: (n, 0, 0, 0, 0)),
                pl.BlockSpec((9 * Cin, Cmid), lambda n: (0, 0)),
                pl.BlockSpec((1, Cmid), lambda n: (0, 0)),
                pl.BlockSpec((9 * Cmid, Cout_pad), lambda n: (0, 0)),
                pl.BlockSpec((1, Cout_pad), lambda n: (0, 0)),
            ],
            out_specs=pl.BlockSpec((1, Hp * Wp, Cout_pad), lambda n: (n, 0, 0)),
            scratch_shapes=[
                pltpu.VMEM((Hp + 2, Wp + 2, Cin), jnp.float32),   # pad1
                pltpu.VMEM((Hp, Wp, 9 * Cin), jnp.float32),       # im2col 1
                pltpu.VMEM((Hp + 2, Wp + 2, Cmid), jnp.float32),  # pad2
                pltpu.VMEM((Hp, Wp, 9 * Cmid), jnp.float32),      # im2col 2
            ],
        ),
        compiler_params=pltpu.CompilerParams(
            dimension_semantics=("parallel",)),
    )(x_pool, w1, b1, w2, b2)

    out = out[:, :, :Cout].reshape(N, Hp, Wp, Cout)
    return jnp.transpose(out, (0, 3, 1, 2))  # NHWC -> NCHW


# ----------------------------------------------------------------------------
# Pure-JAX reference (for correctness check).
# ----------------------------------------------------------------------------
def _ref_forward(x_nchw, params):
    x = jnp.transpose(x_nchw, (0, 2, 3, 1))
    N, H, W, C = x.shape
    x = jnp.max(x.reshape(N, H // 2, 2, W // 2, 2, C), axis=(2, 4))

    def conv(xx, w, b):
        y = jax.lax.conv_general_dilated(
            xx, jnp.transpose(w, (2, 3, 1, 0)),  # HWIO
            window_strides=(1, 1), padding="SAME",
            dimension_numbers=("NHWC", "HWIO", "NHWC"),
        )
        return jnp.maximum(y + b.reshape(1, 1, 1, -1), 0.0)

    x = conv(x, params["w1"], params["b1"])
    x = conv(x, params["w2"], params["b2"])
    return jnp.transpose(x, (0, 3, 1, 2))


if __name__ == "__main__":
    key = jax.random.PRNGKey(0)
    k_x, k_w1, k_b1, k_w2, k_b2 = jax.random.split(key, 5)

    N, C_in, C_out, H, W = 2, 4, 8, 16, 16
    x = jax.random.normal(k_x, (N, C_in, H, W), dtype=jnp.float32)

    # PyTorch Conv2d weight layout: OIHW.
    params = {
        "w1": 0.1 * jax.random.normal(k_w1, (C_out, C_in, 3, 3), jnp.float32),
        "b1": 0.1 * jax.random.normal(k_b1, (C_out,), jnp.float32),
        "w2": 0.1 * jax.random.normal(k_w2, (C_out, C_out, 3, 3), jnp.float32),
        "b2": 0.1 * jax.random.normal(k_b2, (C_out,), jnp.float32),
    }

    fwd = jax.jit(unet_left_forward)
    out = jax.block_until_ready(fwd(x, params))
    ref = jax.block_until_ready(_ref_forward(x, params))

    assert out.shape == (N, C_out, H // 2, W // 2), out.shape
    assert jnp.allclose(out, ref, atol=1e-4, rtol=1e-4), (
        "mismatch vs reference, max abs err = "
        + str(float(jnp.max(jnp.abs(out - ref)))))

    print("KERNEL_OK")
</pallas_src>

<mosaic_0001>
module attributes {stable_mosaic.version = 11 : i64} {
  func.func @_fused_unet_left_kernel(%arg0: i32, %arg1: memref<1x4x8x8x4xf32, #tpu.memory_space<vmem>>, %arg2: memref<36x8xf32, #tpu.memory_space<vmem>>, %arg3: memref<1x8xf32, #tpu.memory_space<vmem>>, %arg4: memref<72x128xf32, #tpu.memory_space<vmem>>, %arg5: memref<1x128xf32, #tpu.memory_space<vmem>>, %arg6: memref<1x64x128xf32, #tpu.memory_space<vmem>>, %arg7: memref<10x10x4xf32, #tpu.memory_space<vmem>>, %arg8: memref<8x8x36xf32, #tpu.memory_space<vmem>>, %arg9: memref<10x10x8xf32, #tpu.memory_space<vmem>>, %arg10: memref<8x8x72xf32, #tpu.memory_space<vmem>>) attributes {dimension_semantics = [#tpu.dimension_semantics<parallel>], iteration_bounds = array<i64: 2>, scalar_prefetch = 0 : i64, scratch_operands = 4 : i64, tpu.core_type = #tpu.core_type<tc>, window_params = [{transform_indices = @transform_0, window_bounds = array<i64: 1, 4, 8, 8, 4>}, {pipeline_mode = #tpu.pipeline_mode<synchronous>, transform_indices = @transform_1, window_bounds = array<i64: 36, 8>}, {pipeline_mode = #tpu.pipeline_mode<synchronous>, transform_indices = @transform_2, window_bounds = array<i64: 1, 8>}, {pipeline_mode = #tpu.pipeline_mode<synchronous>, transform_indices = @transform_3, window_bounds = array<i64: 72, 128>}, {pipeline_mode = #tpu.pipeline_mode<synchronous>, transform_indices = @transform_4, window_bounds = array<i64: 1, 128>}, {transform_indices = @transform_5, window_bounds = array<i64: 1, 64, 128>}]} {
    %c0 = arith.constant 0 : index
    %c0_0 = arith.constant 0 : index
    %c0_1 = arith.constant 0 : index
    %c0_2 = arith.constant 0 : index
    %c0_3 = arith.constant 0 : index
    %0 = vector.load %arg1[%c0, %c0_0, %c0_1, %c0_2, %c0_3] : memref<1x4x8x8x4xf32, #tpu.memory_space<vmem>>, vector<1x1x8x8x4xf32>
    %1 = vector.shape_cast %0 : vector<1x1x8x8x4xf32> to vector<8x8x4xf32>
    %c0_4 = arith.constant 0 : index
    %c1 = arith.constant 1 : index
    %c0_5 = arith.constant 0 : index
    %c0_6 = arith.constant 0 : index
    %c0_7 = arith.constant 0 : index
    %2 = vector.load %arg1[%c0_4, %c1, %c0_5, %c0_6, %c0_7] : memref<1x4x8x8x4xf32, #tpu.memory_space<vmem>>, vector<1x1x8x8x4xf32>
    %3 = vector.shape_cast %2 : vector<1x1x8x8x4xf32> to vector<8x8x4xf32>
    %4 = arith.maximumf %1, %3 : vector<8x8x4xf32>
    %c0_8 = arith.constant 0 : index
    %c2 = arith.constant 2 : index
    %c0_9 = arith.constant 0 : index
    %c0_10 = arith.constant 0 : index
    %c0_11 = arith.constant 0 : index
    %5 = vector.load %arg1[%c0_8, %c2, %c0_9, %c0_10, %c0_11] : memref<1x4x8x8x4xf32, #tpu.memory_space<vmem>>, vector<1x1x8x8x4xf32>
    %6 = vector.shape_cast %5 : vector<1x1x8x8x4xf32> to vector<8x8x4xf32>
    %c0_12 = arith.constant 0 : index
    %c3 = arith.constant 3 : index
    %c0_13 = arith.constant 0 : index
    %c0_14 = arith.constant 0 : index
    %c0_15 = arith.constant 0 : index
    %7 = vector.load %arg1[%c0_12, %c3, %c0_13, %c0_14, %c0_15] : memref<1x4x8x8x4xf32, #tpu.memory_space<vmem>>, vector<1x1x8x8x4xf32>
    %8 = vector.shape_cast %7 : vector<1x1x8x8x4xf32> to vector<8x8x4xf32>
    %9 = arith.maximumf %6, %8 : vector<8x8x4xf32>
    %10 = arith.maximumf %4, %9 : vector<8x8x4xf32>
    %cst = arith.constant 0.000000e+00 : f32
    %11 = vector.broadcast %cst : f32 to vector<10x10x4xf32>
    %c0_16 = arith.constant 0 : index
    %c0_17 = arith.constant 0 : index
    %c0_18 = arith.constant 0 : index
    %12 = vector.load %arg7[%c0_16, %c0_17, %c0_18] : memref<10x10x4xf32, #tpu.memory_space<vmem>>, vector<10x10x4xf32>
    tpu.vector_store %arg7[%c0_16, %c0_17, %c0_18], %11 {strides = array<i32>} : memref<10x10x4xf32, #tpu.memory_space<vmem>>, vector<10x10x4xf32>,
    %c1_19 = arith.constant 1 : index
    %c1_20 = arith.constant 1 : index
    %c0_21 = arith.constant 0 : index
    %13 = vector.load %arg7[%c1_19, %c1_20, %c0_21] : memref<10x10x4xf32, #tpu.memory_space<vmem>>, vector<8x8x4xf32>
    tpu.vector_store %arg7[%c1_19, %c1_20, %c0_21], %10 {strides = array<i32>} : memref<10x10x4xf32, #tpu.memory_space<vmem>>, vector<8x8x4xf32>,
    %c0_22 = arith.constant 0 : index
    %c0_23 = arith.constant 0 : index
    %c0_24 = arith.constant 0 : index
    %14 = vector.load %arg7[%c0_22, %c0_23, %c0_24] : memref<10x10x4xf32, #tpu.memory_space<vmem>>, vector<8x8x4xf32>
    %c0_25 = arith.constant 0 : index
    %c0_26 = arith.constant 0 : index
    %c0_27 = arith.constant 0 : index
    %15 = vector.load %arg8[%c0_25, %c0_26, %c0_27] : memref<8x8x36xf32, #tpu.memory_space<vmem>>, vector<8x8x4xf32>
    tpu.vector_store %arg8[%c0_25, %c0_26, %c0_27], %14 {strides = array<i32>} : memref<8x8x36xf32, #tpu.memory_space<vmem>>, vector<8x8x4xf32>,
    %c0_28 = arith.constant 0 : index
    %c1_29 = arith.constant 1 : index
    %c0_30 = arith.constant 0 : index
    %16 = vector.load %arg7[%c0_28, %c1_29, %c0_30] : memref<10x10x4xf32, #tpu.memory_space<vmem>>, vector<8x8x4xf32>
    %c0_31 = arith.constant 0 : index
    %c0_32 = arith.constant 0 : index
    %c4 = arith.constant 4 : index
    %17 = vector.load %arg8[%c0_31, %c0_32, %c4] : memref<8x8x36xf32, #tpu.memory_space<vmem>>, vector<8x8x4xf32>
    tpu.vector_store %arg8[%c0_31, %c0_32, %c4], %16 {strides = array<i32>} : memref<8x8x36xf32, #tpu.memory_space<vmem>>, vector<8x8x4xf32>,
    %c0_33 = arith.constant 0 : index
    %c2_34 = arith.constant 2 : index
    %c0_35 = arith.constant 0 : index
    %18 = vector.load %arg7[%c0_33, %c2_34, %c0_35] : memref<10x10x4xf32, #tpu.memory_space<vmem>>, vector<8x8x4xf32>
    %c0_36 = arith.constant 0 : index
    %c0_37 = arith.constant 0 : index
    %c8 = arith.constant 8 : index
    %19 = vector.load %arg8[%c0_36, %c0_37, %c8] : memref<8x8x36xf32, #tpu.memory_space<vmem>>, vector<8x8x4xf32>
    tpu.vector_store %arg8[%c0_36, %c0_37, %c8], %18 {strides = array<i32>} : memref<8x8x36xf32, #tpu.memory_space<vmem>>, vector<8x8x4xf32>,
    %c1_38 = arith.constant 1 : index
    %c0_39 = arith.constant 0 : index
    %c0_40 = arith.constant 0 : index
    %20 = vector.load %arg7[%c1_38, %c0_39, %c0_40] : memref<10x10x4xf32, #tpu.memory_space<vmem>>, vector<8x8x4xf32>
    %c0_41 = arith.constant 0 : index
    %c0_42 = arith.constant 0 : index
    %c12 = arith.constant 12 : index
    %21 = vector.load %arg8[%c0_41, %c0_42, %c12] : memref<8x8x36xf32, #tpu.memory_space<vmem>>, vector<8x8x4xf32>
    tpu.vector_store %arg8[%c0_41, %c0_42, %c12], %20 {strides = array<i32>} : memref<8x8x36xf32, #tpu.memory_space<vmem>>, vector<8x8x4xf32>,
    %c1_43 = arith.constant 1 : index
    %c1_44 = arith.constant 1 : index
    %c0_45 = arith.constant 0 : index
    %22 = vector.load %arg7[%c1_43, %c1_44, %c0_45] : memref<10x10x4xf32, #tpu.memory_space<vmem>>, vector<8x8x4xf32>
    %c0_46 = arith.constant 0 : index
    %c0_47 = arith.constant 0 : index
    %c16 = arith.constant 16 : index
    %23 = vector.load %arg8[%c0_46, %c0_47, %c16] : memref<8x8x36xf32, #tpu.memory_space<vmem>>, vector<8x8x4xf32>
    tpu.vector_store %arg8[%c0_46, %c0_47, %c16], %22 {strides = array<i32>} : memref<8x8x36xf32, #tpu.memory_space<vmem>>, vector<8x8x4xf32>,
    %c1_48 = arith.constant 1 : index
    %c2_49 = arith.constant 2 : index
    %c0_50 = arith.constant 0 : index
    %24 = vector.load %arg7[%c1_48, %c2_49, %c0_50] : memref<10x10x4xf32, #tpu.memory_space<vmem>>, vector<8x8x4xf32>
    %c0_51 = arith.constant 0 : index
    %c0_52 = arith.constant 0 : index
    %c20 = arith.constant 20 : index
    %25 = vector.load %arg8[%c0_51, %c0_52, %c20] : memref<8x8x36xf32, #tpu.memory_space<vmem>>, vector<8x8x4xf32>
    tpu.vector_store %arg8[%c0_51, %c0_52, %c20], %24 {strides = array<i32>} : memref<8x8x36xf32, #tpu.memory_space<vmem>>, vector<8x8x4xf32>,
    %c2_53 = arith.constant 2 : index
    %c0_54 = arith.constant 0 : index
    %c0_55 = arith.constant 0 : index
    %26 = vector.load %arg7[%c2_53, %c0_54, %c0_55] : memref<10x10x4xf32, #tpu.memory_space<vmem>>, vector<8x8x4xf32>
    %c0_56 = arith.constant 0 : index
    %c0_57 = arith.constant 0 : index
    %c24 = arith.constant 24 : index
    %27 = vector.load %arg8[%c0_56, %c0_57, %c24] : memref<8x8x36xf32, #tpu.memory_space<vmem>>, vector<8x8x4xf32>
    tpu.vector_store %arg8[%c0_56, %c0_57, %c24], %26 {strides = array<i32>} : memref<8x8x36xf32, #tpu.memory_space<vmem>>, vector<8x8x4xf32>,
    %c2_58 = arith.constant 2 : index
    %c1_59 = arith.constant 1 : index
    %c0_60 = arith.constant 0 : index
    %28 = vector.load %arg7[%c2_58, %c1_59, %c0_60] : memref<10x10x4xf32, #tpu.memory_space<vmem>>, vector<8x8x4xf32>
    %c0_61 = arith.constant 0 : index
    %c0_62 = arith.constant 0 : index
    %c28 = arith.constant 28 : index
    %29 = vector.load %arg8[%c0_61, %c0_62, %c28] : memref<8x8x36xf32, #tpu.memory_space<vmem>>, vector<8x8x4xf32>
    tpu.vector_store %arg8[%c0_61, %c0_62, %c28], %28 {strides = array<i32>} : memref<8x8x36xf32, #tpu.memory_space<vmem>>, vector<8x8x4xf32>,
    %c2_63 = arith.constant 2 : index
    %c2_64 = arith.constant 2 : index
    %c0_65 = arith.constant 0 : index
    %30 = vector.load %arg7[%c2_63, %c2_64, %c0_65] : memref<10x10x4xf32, #tpu.memory_space<vmem>>, vector<8x8x4xf32>
    %c0_66 = arith.constant 0 : index
    %c0_67 = arith.constant 0 : index
    %c32 = arith.constant 32 : index
    %31 = vector.load %arg8[%c0_66, %c0_67, %c32] : memref<8x8x36xf32, #tpu.memory_space<vmem>>, vector<8x8x4xf32>
    tpu.vector_store %arg8[%c0_66, %c0_67, %c32], %30 {strides = array<i32>} : memref<8x8x36xf32, #tpu.memory_space<vmem>>, vector<8x8x4xf32>,
    %c0_68 = arith.constant 0 : index
    %c0_69 = arith.constant 0 : index
    %c0_70 = arith.constant 0 : index
    %32 = vector.load %arg8[%c0_68, %c0_69, %c0_70] : memref<8x8x36xf32, #tpu.memory_space<vmem>>, vector<8x8x36xf32>
    %33 = vector.shape_cast %32 : vector<8x8x36xf32> to vector<64x36xf32>
    %c0_71 = arith.constant 0 : index
    %c0_72 = arith.constant 0 : index
    %34 = vector.load %arg2[%c0_71, %c0_72] : memref<36x8xf32, #tpu.memory_space<vmem>>, vector<36x8xf32>
    %cst_73 = arith.constant dense<0.000000e+00> : vector<64x8xf32>
    %35 = tpu.matmul %33, %34, %cst_73 {dimension_numbers = #tpu.dot_dimension_numbers<[1], [0], [0], [1], [0, 0, 1, 1], [], []>} : vector<64x36xf32>, vector<36x8xf32>, vector<64x8xf32> -> vector<64x8xf32>
    %c0_74 = arith.constant 0 : index
    %c0_75 = arith.constant 0 : index
    %36 = vector.load %arg3[%c0_74, %c0_75] : memref<1x8xf32, #tpu.memory_space<vmem>>, vector<1x8xf32>
    %37 = vector.broadcast %36 : vector<1x8xf32> to vector<64x8xf32>
    %38 = arith.addf %35, %37 : vector<64x8xf32>
    %cst_76 = arith.constant 0.000000e+00 : f32
    %39 = vector.broadcast %cst_76 : f32 to vector<64x8xf32>
    %40 = arith.maximumf %38, %39 : vector<64x8xf32>
    %41 = vector.shape_cast %40 : vector<64x8xf32> to vector<8x8x8xf32>
    %cst_77 = arith.constant 0.000000e+00 : f32
    %42 = vector.broadcast %cst_77 : f32 to vector<10x10x8xf32>
    %c0_78 = arith.constant 0 : index
    %c0_79 = arith.constant 0 : index
    %c0_80 = arith.constant 0 : index
    %43 = vector.load %arg9[%c0_78, %c0_79, %c0_80] : memref<10x10x8xf32, #tpu.memory_space<vmem>>, vector<10x10x8xf32>
    tpu.vector_store %arg9[%c0_78, %c0_79, %c0_80], %42 {strides = array<i32>} : memref<10x10x8xf32, #tpu.memory_space<vmem>>, vector<10x10x8xf32>,
    %c1_81 = arith.constant 1 : index
    %c1_82 = arith.constant 1 : index
    %c0_83 = arith.constant 0 : index
    %44 = vector.load %arg9[%c1_81, %c1_82, %c0_83] : memref<10x10x8xf32, #tpu.memory_space<vmem>>, vector<8x8x8xf32>
    tpu.vector_store %arg9[%c1_81, %c1_82, %c0_83], %41 {strides = array<i32>} : memref<10x10x8xf32, #tpu.memory_space<vmem>>, vector<8x8x8xf32>,
    %c0_84 = arith.constant 0 : index
    %c0_85 = arith.constant 0 : index
    %c0_86 = arith.constant 0 : index
    %45 = vector.load %arg9[%c0_84, %c0_85, %c0_86] : memref<10x10x8xf32, #tpu.memory_space<vmem>>, vector<8x8x8xf32>
    %c0_87 = arith.constant 0 : index
    %c0_88 = arith.constant 0 : index
    %c0_89 = arith.constant 0 : index
    %46 = vector.load %arg10[%c0_87, %c0_88, %c0_89] : memref<8x8x72xf32, #tpu.memory_space<vmem>>, vector<8x8x8xf32>
    tpu.vector_store %arg10[%c0_87, %c0_88, %c0_89], %45 {strides = array<i32>} : memref<8x8x72xf32, #tpu.memory_space<vmem>>, vector<8x8x8xf32>,
    %c0_90 = arith.constant 0 : index
    %c1_91 = arith.constant 1 : index
    %c0_92 = arith.constant 0 : index
    %47 = vector.load %arg9[%c0_90, %c1_91, %c0_92] : memref<10x10x8xf32, #tpu.memory_space<vmem>>, vector<8x8x8xf32>
    %c0_93 = arith.constant 0 : index
    %c0_94 = arith.constant 0 : index
    %c8_95 = arith.constant 8 : index
    %48 = vector.load %arg10[%c0_93, %c0_94, %c8_95] : memref<8x8x72xf32, #tpu.memory_space<vmem>>, vector<8x8x8xf32>
    tpu.vector_store %arg10[%c0_93, %c0_94, %c8_95], %47 {strides = array<i32>} : memref<8x8x72xf32, #tpu.memory_space<vmem>>, vector<8x8x8xf32>,
    %c0_96 = arith.constant 0 : index
    %c2_97 = arith.constant 2 : index
    %c0_98 = arith.constant 0 : index
    %49 = vector.load %arg9[%c0_96, %c2_97, %c0_98] : memref<10x10x8xf32, #tpu.memory_space<vmem>>, vector<8x8x8xf32>
    %c0_99 = arith.constant 0 : index
    %c0_100 = arith.constant 0 : index
    %c16_101 = arith.constant 16 : index
    %50 = vector.load %arg10[%c0_99, %c0_100, %c16_101] : memref<8x8x72xf32, #tpu.memory_space<vmem>>, vector<8x8x8xf32>
    tpu.vector_store %arg10[%c0_99, %c0_100, %c16_101], %49 {strides = array<i32>} : memref<8x8x72xf32, #tpu.memory_space<vmem>>, vector<8x8x8xf32>,
    %c1_102 = arith.constant 1 : index
    %c0_103 = arith.constant 0 : index
    %c0_104 = arith.constant 0 : index
    %51 = vector.load %arg9[%c1_102, %c0_103, %c0_104] : memref<10x10x8xf32, #tpu.memory_space<vmem>>, vector<8x8x8xf32>
    %c0_105 = arith.constant 0 : index
    %c0_106 = arith.constant 0 : index
    %c24_107 = arith.constant 24 : index
    %52 = vector.load %arg10[%c0_105, %c0_106, %c24_107] : memref<8x8x72xf32, #tpu.memory_space<vmem>>, vector<8x8x8xf32>
    tpu.vector_store %arg10[%c0_105, %c0_106, %c24_107], %51 {strides = array<i32>} : memref<8x8x72xf32, #tpu.memory_space<vmem>>, vector<8x8x8xf32>,
    %c1_108 = arith.constant 1 : index
    %c1_109 = arith.constant 1 : index
    %c0_110 = arith.constant 0 : index
    %53 = vector.load %arg9[%c1_108, %c1_109, %c0_110] : memref<10x10x8xf32, #tpu.memory_space<vmem>>, vector<8x8x8xf32>
    %c0_111 = arith.constant 0 : index
    %c0_112 = arith.constant 0 : index
    %c32_113 = arith.constant 32 : index
    %54 = vector.load %arg10[%c0_111, %c0_112, %c32_113] : memref<8x8x72xf32, #tpu.memory_space<vmem>>, vector<8x8x8xf32>
    tpu.vector_store %arg10[%c0_111, %c0_112, %c32_113], %53 {strides = array<i32>} : memref<8x8x72xf32, #tpu.memory_space<vmem>>, vector<8x8x8xf32>,
    %c1_114 = arith.constant 1 : index
    %c2_115 = arith.constant 2 : index
    %c0_116 = arith.constant 0 : index
    %55 = vector.load %arg9[%c1_114, %c2_115, %c0_116] : memref<10x10x8xf32, #tpu.memory_space<vmem>>, vector<8x8x8xf32>
    %c0_117 = arith.constant 0 : index
    %c0_118 = arith.constant 0 : index
    %c40 = arith.constant 40 : index
    %56 = vector.load %arg10[%c0_117, %c0_118, %c40] : memref<8x8x72xf32, #tpu.memory_space<vmem>>, vector<8x8x8xf32>
    tpu.vector_store %arg10[%c0_117, %c0_118, %c40], %55 {strides = array<i32>} : memref<8x8x72xf32, #tpu.memory_space<vmem>>, vector<8x8x8xf32>,
    %c2_119 = arith.constant 2 : index
    %c0_120 = arith.constant 0 : index
    %c0_121 = arith.constant 0 : index
    %57 = vector.load %arg9[%c2_119, %c0_120, %c0_121] : memref<10x10x8xf32, #tpu.memory_space<vmem>>, vector<8x8x8xf32>
    %c0_122 = arith.constant 0 : index
    %c0_123 = arith.constant 0 : index
    %c48 = arith.constant 48 : index
    %58 = vector.load %arg10[%c0_122, %c0_123, %c48] : memref<8x8x72xf32, #tpu.memory_space<vmem>>, vector<8x8x8xf32>
    tpu.vector_store %arg10[%c0_122, %c0_123, %c48], %57 {strides = array<i32>} : memref<8x8x72xf32, #tpu.memory_space<vmem>>, vector<8x8x8xf32>,
    %c2_124 = arith.constant 2 : index
    %c1_125 = arith.constant 1 : index
    %c0_126 = arith.constant 0 : index
    %59 = vector.load %arg9[%c2_124, %c1_125, %c0_126] : memref<10x10x8xf32, #tpu.memory_space<vmem>>, vector<8x8x8xf32>
    %c0_127 = arith.constant 0 : index
    %c0_128 = arith.constant 0 : index
    %c56 = arith.constant 56 : index
    %60 = vector.load %arg10[%c0_127, %c0_128, %c56] : memref<8x8x72xf32, #tpu.memory_space<vmem>>, vector<8x8x8xf32>
    tpu.vector_store %arg10[%c0_127, %c0_128, %c56], %59 {strides = array<i32>} : memref<8x8x72xf32, #tpu.memory_space<vmem>>, vector<8x8x8xf32>,
    %c2_129 = arith.constant 2 : index
    %c2_130 = arith.constant 2 : index
    %c0_131 = arith.constant 0 : index
    %61 = vector.load %arg9[%c2_129, %c2_130, %c0_131] : memref<10x10x8xf32, #tpu.memory_space<vmem>>, vector<8x8x8xf32>
    %c0_132 = arith.constant 0 : index
    %c0_133 = arith.constant 0 : index
    %c64 = arith.constant 64 : index
    %62 = vector.load %arg10[%c0_132, %c0_133, %c64] : memref<8x8x72xf32, #tpu.memory_space<vmem>>, vector<8x8x8xf32>
    tpu.vector_store %arg10[%c0_132, %c0_133, %c64], %61 {strides = array<i32>} : memref<8x8x72xf32, #tpu.memory_space<vmem>>, vector<8x8x8xf32>,
    %c0_134 = arith.constant 0 : index
    %c0_135 = arith.constant 0 : index
    %c0_136 = arith.constant 0 : index
    %63 = vector.load %arg10[%c0_134, %c0_135, %c0_136] : memref<8x8x72xf32, #tpu.memory_space<vmem>>, vector<8x8x72xf32>
    %64 = vector.shape_cast %63 : vector<8x8x72xf32> to vector<64x72xf32>
    %c0_137 = arith.constant 0 : index
    %c0_138 = arith.constant 0 : index
    %65 = vector.load %arg4[%c0_137, %c0_138] : memref<72x128xf32, #tpu.memory_space<vmem>>, vector<72x128xf32>
    %cst_139 = arith.constant dense<0.000000e+00> : vector<64x128xf32>
    %66 = tpu.matmul %64, %65, %cst_139 {dimension_numbers = #tpu.dot_dimension_numbers<[1], [0], [0], [1], [0, 0, 1, 1], [], []>} : vector<64x72xf32>, vector<72x128xf32>, vector<64x128xf32> -> vector<64x128xf32>
    %c0_140 = arith.constant 0 : index
    %c0_141 = arith.constant 0 : index
    %67 = vector.load %arg5[%c0_140, %c0_141] : memref<1x128xf32, #tpu.memory_space<vmem>>, vector<1x128xf32>
    %68 = vector.broadcast %67 : vector<1x128xf32> to vector<64x128xf32>
    %69 = arith.addf %66, %68 : vector<64x128xf32>
    %cst_142 = arith.constant 0.000000e+00 : f32
    %70 = vector.broadcast %cst_142 : f32 to vector<64x128xf32>
    %71 = arith.maximumf %69, %70 : vector<64x128xf32>
    %c0_143 = arith.constant 0 : index
    %c0_144 = arith.constant 0 : index
    %c0_145 = arith.constant 0 : index
    %72 = vector.load %arg6[%c0_143, %c0_144, %c0_145] : memref<1x64x128xf32, #tpu.memory_space<vmem>>, vector<1x64x128xf32>
    %73 = vector.shape_cast %72 : vector<1x64x128xf32> to vector<64x128xf32>
    %74 = vector.shape_cast %71 : vector<64x128xf32> to vector<1x64x128xf32>
    tpu.vector_store %arg6[%c0_143, %c0_144, %c0_145], %74 {strides = array<i32>} : memref<1x64x128xf32, #tpu.memory_space<vmem>>, vector<1x64x128xf32>,
    return
  }
  func.func @transform_0(%arg0: i32) -> (i32, i32, i32, i32, i32) {
    %c0_i32 = arith.constant 0 : i32
    %c0_i32_0 = arith.constant 0 : i32
    %c0_i32_1 = arith.constant 0 : i32
    %c0_i32_2 = arith.constant 0 : i32
    %c0_i32_3 = arith.constant 0 : i32
    return %arg0, %c0_i32, %c0_i32_0, %c0_i32_1, %c0_i32_2 : i32, i32, i32, i32, i32
  }
  func.func @transform_1(%arg0: i32) -> (i32, i32) {
    %c0_i32 = arith.constant 0 : i32
    %c0_i32_0 = arith.constant 0 : i32
    %c0_i32_1 = arith.constant 0 : i32
    return %c0_i32, %c0_i32_0 : i32, i32
  }
  func.func @transform_2(%arg0: i32) -> (i32, i32) {
    %c0_i32 = arith.constant 0 : i32
    %c0_i32_0 = arith.constant 0 : i32
    %c0_i32_1 = arith.constant 0 : i32
    return %c0_i32, %c0_i32_0 : i32, i32
  }
  func.func @transform_3(%arg0: i32) -> (i32, i32) {
    %c0_i32 = arith.constant 0 : i32
    %c0_i32_0 = arith.constant 0 : i32
    %c0_i32_1 = arith.constant 0 : i32
    return %c0_i32, %c0_i32_0 : i32, i32
  }
  func.func @transform_4(%arg0: i32) -> (i32, i32) {
    %c0_i32 = arith.constant 0 : i32
    %c0_i32_0 = arith.constant 0 : i32
    %c0_i32_1 = arith.constant 0 : i32
    return %c0_i32, %c0_i32_0 : i32, i32
  }
  func.func @transform_5(%arg0: i32) -> (i32, i32, i32) {
    %c0_i32 = arith.constant 0 : i32
    %c0_i32_0 = arith.constant 0 : i32
    %c0_i32_1 = arith.constant 0 : i32
    return %arg0, %c0_i32, %c0_i32_0 : i32, i32, i32
  }
}

</mosaic_0001>

<bundles_post_ra>
// kernel: unet_left_forward.1
= control target key start
LH: loop header
LB: loop body
LE: loop exit
PB: predicated region body
PF: predicated region fallthrough
CT: control target
= control target key end

     0   :  { %s1785_s18 = smov 0   ;;  %s2298_s0 = inlined_call_operand.vmem [shape: f32[2,4,8,8,4], index: 0, kind: input, shape index: {}]   ;;  %s2299_s1 = inlined_call_operand.vmem [shape: f32[36,8], index: 1, kind: input, shape index: {}]   ;;  %s2300_s2 = inlined_call_operand.vmem [shape: f32[1,8], index: 2, kind: input, shape index: {}]   ;;  %s2301_s3 = inlined_call_operand.vmem [shape: f32[72,128], index: 3, kind: input, shape index: {}]   ;;  %s2302_s4 = inlined_call_operand.vmem [shape: f32[1,128], index: 4, kind: input, shape index: {}]   ;;  %s2303_s5 = inlined_call_operand.vmem [shape: f32[2,64,128], index: 5, kind: output, shape index: {}]  }
   0x1 LB: > { %s1551_s19 = sadd.s32 4294967295, %s1740_s18   ;;  %p1555_p0 = scmp.ge.s32.totalorder %s1740_s18, 1  ;;  %s1740_s18 = sphi %s1785_s18, %s15_s18  }
   0x2   : > { %p187_p1 = scmp.lt.s32.totalorder %s1740_s18, 3 }
   0x4   : > { %p188_p2 = pnand %p1555_p0, %p187_p1 }
   0x5   : > { %vm284_vm0 = vcmask (!%p188_p2), 31744   ;;  %vm286_vm1 = vcmask (!%p188_p2), 25600   ;;  %v1742_v0 = vmov (!%p188_p2), 0.0   ;;  %p215_p3 = scmp.lt.s32.totalorder (!%p188_p2), %s1551_s19, 1  ;;  %s1743_s24 = smov (!%p188_p2), 4   ;;  %vm769_vm2 = vcmask (!%p188_p2), 1043456  }
   0x6   : > { %191 = sbr.rel (%p188_p2) target bundleno = 898 (0x382), region = 40  ;;  %285 = vst.msk [vmem:[#allocation2] sm:$0xff] (!%p188_p2), %vm284_vm0, %v1742_v0  ;;  %288 = vst.msk [vmem:[#allocation2 + $0x10] sm:$0xff] (!%p188_p2), %vm284_vm0, %v1742_v0  ;;  %s1744_s25 = smov (!%p188_p2), 8   ;;  %vm371_vm3 = vcmask (!%p188_p2), 64544   ;;  %vm420_vm4 = vcmask (!%p188_p2), 97344  }
   0x7   : > { %287 = vst.msk [vmem:[#allocation2 + $0x8] sm:$0x3] (!%p188_p2), %vm286_vm1, %v1742_v0  ;;  %289 = vst.msk [vmem:[#allocation2 + $0x18] sm:$0x3] (!%p188_p2), %vm286_vm1, %v1742_v0  ;;  %s1745_s26 = smov (!%p188_p2), 12   ;;  %s1746_s27 = smov (!%p188_p2), 16  }
   0x8   : > { %290 = vst.msk [vmem:[#allocation2 + $0x20] sm:$0xff] (!%p188_p2), %vm284_vm0, %v1742_v0  ;;  %292 = vst.msk [vmem:[#allocation2 + $0x30] sm:$0xff] (!%p188_p2), %vm284_vm0, %v1742_v0  ;;  %s1747_s28 = smov (!%p188_p2), 20   ;;  %s1748_s29 = smov (!%p188_p2), 24   ;;  %vm469_vm5 = vcmask (!%p188_p2), 130144   ;;  %vm518_vm6 = vcmask (!%p188_p2), 162944  }
   0x9   : > { %291 = vst.msk [vmem:[#allocation2 + $0x28] sm:$0x3] (!%p188_p2), %vm286_vm1, %v1742_v0  ;;  %293 = vst.msk [vmem:[#allocation2 + $0x38] sm:$0x3] (!%p188_p2), %vm286_vm1, %v1742_v0  ;;  %s1749_s9 = smov (!%p188_p2), 28   ;;  %s1750_s16 = smov (!%p188_p2), 32  }
   0xa   : > { %294 = vst.msk [vmem:[#allocation2 + $0x40] sm:$0xff] (!%p188_p2), %vm284_vm0, %v1742_v0  ;;  %296 = vst.msk [vmem:[#allocation2 + $0x50] sm:$0xff] (!%p188_p2), %vm284_vm0, %v1742_v0  ;;  %vm567_vm7 = vcmask (!%p188_p2), 195744   ;;  %vm617_vm8 = vcmask (!%p188_p2), 228544   ;;  %vm666_vm9 = vcmask (!%p188_p2), 261344   ;;  %vm715_vm10 = vcmask (!%p188_p2), 294144  }
   0xb   : > { %295 = vst.msk [vmem:[#allocation2 + $0x48] sm:$0x3] (!%p188_p2), %vm286_vm1, %v1742_v0  ;;  %297 = vst.msk [vmem:[#allocation2 + $0x58] sm:$0x3] (!%p188_p2), %vm286_vm1, %v1742_v0  ;;  %vm744_vm11 = vcmask (!%p188_p2), 293888   ;;  %vm886_vm12 = vcmask (!%p188_p2), 64512  }
   0xc   : > { %298 = vst.msk [vmem:[#allocation2 + $0x60] sm:$0xff] (!%p188_p2), %vm284_vm0, %v1742_v0  ;;  %300 = vst.msk [vmem:[#allocation2 + $0x70] sm:$0xff] (!%p188_p2), %vm284_vm0, %v1742_v0  ;;  %vm888_vm13 = vcmask (!%p188_p2), 58368   ;;  %s1751_s17 = smov (!%p188_p2), 48   ;;  %vm973_vm14 = vcmask (!%p188_p2), 130112   ;;  %vm1022_vm15 = vcmask (!%p188_p2), 195712  }
   0xd   : > { %299 = vst.msk [vmem:[#allocation2 + $0x68] sm:$0x3] %vm286_vm1, %v1742_v0  ;;  %301 = vst.msk [vmem:[#allocation2 + $0x78] sm:$0x3] %vm286_vm1, %v1742_v0  ;;  %s2305_s19 = smov (!%p215_p3, %s1551_s19), 1  ;;  %v315_v11 = vld [vmem:[#allocation2] sm:$0xff] }
   0xe   : > { %302 = vst.msk [vmem:[#allocation2 + $0x80] sm:$0xff] %vm284_vm0, %v1742_v0  ;;  %304 = vst.msk [vmem:[#allocation2 + $0x90] sm:$0xff] %vm284_vm0, %v1742_v0  ;;  %s1605_s20 = sshll.u32 %s2305_s19, 8  ;;  %v331_v4 = vld [vmem:[#allocation2 + $0x1] sm:$0xff] }
   0xf   : > { %303 = vst.msk [vmem:[#allocation2 + $0x88] sm:$0x3] %vm286_vm1, %v1742_v0  ;;  %305 = vst.msk [vmem:[#allocation2 + $0x98] sm:$0x3] %vm286_vm1, %v1742_v0  ;;  %s1839_s23 = scalar_lea.vmem %s2298_s0, %s1605_s20  ;;  %v380_v5 = vld [vmem:[#allocation2 + $0x2] sm:$0xff]  ;;  %347 = vrot.lane.b32.xlu0 %v331_v4, %s1743_s24  ;;  %s1752_s20 = smov 56  }
  0x10   : > { %v225_v1 = vld [vmem:[%s1839_s23] sm:$0xff]  ;;  %396 = vrot.lane.b32.xlu1 %v380_v5, %s1744_s25  ;;  %v226_v9 = vld [vmem:[%s1839_s23 + $0x8] sm:$0xff]  ;;  %v227_v15 = vld [vmem:[%s1839_s23 + $0x10] sm:$0xff]  ;;  %323 = vst.msk [vmem:[#allocation3] sm:$0xff] %vm284_vm0, %v315_v11  ;;  %vm1120_vm1 = vcmask 326912  }
  0x11   : > { %v1560_v2 = vld [vmem:[%s1839_s23 + $0x40] sm:$0xff]  ;;  %v1561_v10 = vld [vmem:[%s1839_s23 + $0x48] sm:$0xff]  ;;  %v1562_v18 = vld [vmem:[%s1839_s23 + $0x50] sm:$0xff]  ;;  %892 = vst.msk [vmem:[#allocation4 + $0x20] sm:$0xff] %vm886_vm12, %v1742_v0 }
  0x12   : > { %v1568_v3 = vld [vmem:[%s1839_s23 + $0x80] sm:$0xff]  ;;  %v242_v6 = vmax.f32 %v225_v1, %v1560_v2  ;;  %v243_v12 = vmax.f32 %v226_v9, %v1561_v10  ;;  %v1569_v13 = vld [vmem:[%s1839_s23 + $0x88] sm:$0xff]  ;;  %v1570_v19 = vld [vmem:[%s1839_s23 + $0x90] sm:$0xff]  ;;  %v244_v21 = vmax.f32 %v227_v15, %v1562_v18  ;;  %893 = vst.msk [vmem:[#allocation4 + $0x28] sm:$0x3] %vm888_vm13, %v1742_v0 }
  0x13   : > { %v1576_v7 = vld [vmem:[%s1839_s23 + $0xc0] sm:$0xff]  ;;  %v1577_v14 = vld [vmem:[%s1839_s23 + $0xc8] sm:$0xff]  ;;  %v1578_v20 = vld [vmem:[%s1839_s23 + $0xd0] sm:$0xff]  ;;  %887 = vst.msk [vmem:[#allocation4] sm:$0xff] %vm886_vm12, %v1742_v0 }
  0x14   : > { %v268_v8 = vmax.f32 %v1568_v3, %v1576_v7  ;;  %v269_v17 = vmax.f32 %v1569_v13, %v1577_v14  ;;  %v270_v22 = vmax.f32 %v1570_v19, %v1578_v20  ;;  %v228_v23 = vld [vmem:[%s1839_s23 + $0x18] sm:$0xff]  ;;  %v229_v29 = vld [vmem:[%s1839_s23 + $0x20] sm:$0xff]  ;;  %v230_v36 = vld [vmem:[%s1839_s23 + $0x28] sm:$0xff]  ;;  %889 = vst.msk [vmem:[#allocation4 + $0x8] sm:$0x3] %vm888_vm13, %v1742_v0 }
  0x15   : > { %v1563_v24 = vld [vmem:[%s1839_s23 + $0x58] sm:$0xff]  ;;  %v1564_v30 = vld [vmem:[%s1839_s23 + $0x60] sm:$0xff]  ;;  %v1565_v38 = vld [vmem:[%s1839_s23 + $0x68] sm:$0xff]  ;;  %890 = vst.msk [vmem:[#allocation4 + $0x10] sm:$0xff] %vm886_vm12, %v1742_v0 }
  0x16   : > { %v276_v16 = vmax.f32 %v242_v6, %v268_v8  ;;  %v1571_v25 = vld [vmem:[%s1839_s23 + $0x98] sm:$0xff]  ;;  %v277_v26 = vmax.f32 %v243_v12, %v269_v17  ;;  %v245_v27 = vmax.f32 %v228_v23, %v1563_v24  ;;  %v278_v31 = vmax.f32 %v244_v21, %v270_v22  ;;  %v1572_v34 = vld [vmem:[%s1839_s23 + $0xa0] sm:$0xff]  ;;  %v1573_v39 = vld [vmem:[%s1839_s23 + $0xa8] sm:$0xff]  ;;  %891 = vst.msk [vmem:[#allocation4 + $0x18] sm:$0x3] %vm888_vm13, %v1742_v0 }
  0x17   : > { %v1579_v28 = vld [vmem:[%s1839_s23 + $0xd8] sm:$0xff]  ;;  %v246_v33 = vmax.f32 %v229_v29, %v1564_v30  ;;  %v1580_v35 = vld [vmem:[%s1839_s23 + $0xe0] sm:$0xff]  ;;  %v1581_v40 = vld [vmem:[%s1839_s23 + $0xe8] sm:$0xff]  ;;  %v247_v42 = vmax.f32 %v230_v36, %v1565_v38  ;;  %894 = vst.msk [vmem:[#allocation4 + $0x30] sm:$0xff] %vm886_vm12, %v1742_v0 }
  0x18   : > { %307 = vst.msk [vmem:[#allocation2 + $0x11] sm:$0xff] %vm284_vm0, %v276_v16  ;;  %v271_v32 = vmax.f32 %v1571_v25, %v1579_v28  ;;  %308 = vst.msk [vmem:[#allocation2 + $0x21] sm:$0xff] %vm284_vm0, %v277_v26  ;;  %v272_v37 = vmax.f32 %v1572_v34, %v1580_v35  ;;  %v273_v43 = vmax.f32 %v1573_v39, %v1581_v40  ;;  %v231_v44 = vld [vmem:[%s1839_s23 + $0x30] sm:$0xff]  ;;  %v232_v50 = vld [vmem:[%s1839_s23 + $0x38] sm:$0xff] }
  0x19   : > { %309 = vst.msk [vmem:[#allocation2 + $0x31] sm:$0xff] %vm284_vm0, %v278_v31  ;;  %v1566_v45 = vld [vmem:[%s1839_s23 + $0x70] sm:$0xff]  ;;  %v1567_v51 = vld [vmem:[%s1839_s23 + $0x78] sm:$0xff]  ;;  %v732_v10 = vld [vmem:[%s2299_s1] sm:$0xff] }
  0x1a   : > { %v279_v41 = vmax.f32 %v245_v27, %v271_v32  ;;  %v1574_v46 = vld [vmem:[%s1839_s23 + $0xb0] sm:$0xff]  ;;  %v280_v47 = vmax.f32 %v246_v33, %v272_v37  ;;  %v248_v48 = vmax.f32 %v231_v44, %v1566_v45  ;;  %v281_v52 = vmax.f32 %v247_v42, %v273_v43  ;;  %v1575_v55 = vld [vmem:[%s1839_s23 + $0xb8] sm:$0xff]  ;;  %v733_v11 = vld [vmem:[%s2299_s1 + $0x8] sm:$0xff]  ;;  %895 = vst.msk [vmem:[#allocation4 + $0x38] sm:$0x3] %vm888_vm13, %v1742_v0 }
  0x1b   : > { %v1582_v49 = vld [vmem:[%s1839_s23 + $0xf0] sm:$0xff]  ;;  %v249_v54 = vmax.f32 %v232_v50, %v1567_v51  ;;  %v1583_v56 = vld [vmem:[%s1839_s23 + $0xf8] sm:$0xff]  ;;  %v1689_v12 = vpack.c.bf16 %v733_v11, %v732_v10  ;;  %v736_v16 = vld [vmem:[%s2299_s1 + $0x20] sm:$0xf]  ;;  %896 = vst.msk [vmem:[#allocation4 + $0x40] sm:$0xff] %vm886_vm12, %v1742_v0  ;;  %s1753_s23 = smov 40  }
  0x1c   : > { %310 = vst.msk [vmem:[#allocation2 + $0x41] sm:$0xff] %vm284_vm0, %v279_v41  ;;  %v274_v53 = vmax.f32 %v1574_v46, %v1582_v49  ;;  %311 = vst.msk [vmem:[#allocation2 + $0x51] sm:$0xff] %vm284_vm0, %v280_v47  ;;  %v275_v57 = vmax.f32 %v1575_v55, %v1583_v56  ;;  %v734_v13 = vld [vmem:[%s2299_s1 + $0x10] sm:$0xff]  ;;  %v735_v14 = vld [vmem:[%s2299_s1 + $0x18] sm:$0xff] }
  0x1d   : > { %312 = vst.msk [vmem:[#allocation2 + $0x61] sm:$0xff] %vm284_vm0, %v281_v52  ;;  %1690 = vmatprep.subr.bf16.mxu0 %v1689_v12  ;;  %v1693_v15 = vpack.c.bf16 %v735_v14, %v734_v13  ;;  %v584_v30 = vld [vmem:[#allocation2 + $0x90] sm:$0xff] }
  0x1e   : > { %v282_v61 = vmax.f32 %v248_v48, %v274_v53  ;;  %v283_v62 = vmax.f32 %v249_v54, %v275_v57  ;;  %1692 = vmatpush3.bf16.msra.mxu0 %v1689_v12  ;;  %v633_v31 = vld [vmem:[#allocation2 + $0x91] sm:$0xff]  ;;  %897 = vst.msk [vmem:[#allocation4 + $0x48] sm:$0x3] %vm888_vm13, %v1742_v0  ;;  %899 = vst.msk [vmem:[#allocation4 + $0x58] sm:$0x3] %vm888_vm13, %v1742_v0 }
  0x1f   : > { %v381_v58 = vld [vmem:[#allocation2 + $0x12] sm:$0xff]  ;;  %v430_v63 = vld [vmem:[#allocation2 + $0x20] sm:$0xff]  ;;  %1694 = vmatprep.subr.bf16.mxu0 %v1693_v15  ;;  %898 = vst.msk [vmem:[#allocation4 + $0x50] sm:$0xff] %vm886_vm12, %v1742_v0  ;;  %900 = vst.msk [vmem:[#allocation4 + $0x60] sm:$0xff] %vm886_vm12, %v1742_v0 }
  0x20   : > { %v332_v59 = vld [vmem:[#allocation2 + $0x11] sm:$0xff]  ;;  %398 = vrot.lane.b32.xlu1 %v381_v58, %s1744_s25  ;;  %313 = vst.msk [vmem:[#allocation2 + $0x71] sm:$0xff] %vm284_vm0, %v282_v61  ;;  %314 = vst.msk [vmem:[#allocation2 + $0x81] sm:$0xff] %vm284_vm0, %v283_v62  ;;  %v333_v3 = vld [vmem:[#allocation2 + $0x21] sm:$0xff] }
  0x21   : > { %v429_v60 = vld [vmem:[#allocation2 + $0x10] sm:$0xff]  ;;  %349 = vrot.lane.b32.xlu0 %v332_v59, %s1743_s24  ;;  %325 = vst.msk [vmem:[#allocation3 + $0x10] sm:$0xff] %vm284_vm0, %v430_v63  ;;  %v382_v7 = vld [vmem:[#allocation2 + $0x22] sm:$0xff] }
  0x22   : > { %324 = vst.msk [vmem:[#allocation3 + $0x8] sm:$0xff] %vm284_vm0, %v429_v60  ;;  %v431_v1 = vld [vmem:[#allocation2 + $0x30] sm:$0xff]  ;;  %1696 = vmatpush3.bf16.msra.mxu0 %v1693_v15 }
  0x23   : > { %326 = vst.msk [vmem:[#allocation3 + $0x18] sm:$0xff] %vm284_vm0, %v431_v1  ;;  %v432_v2 = vld [vmem:[#allocation2 + $0x40] sm:$0xff]  ;;  %v433_v4 = vld [vmem:[#allocation2 + $0x50] sm:$0xff]  ;;  %1645 = vmatprep.subr.msk.mxu0 %vm769_vm2, %v736_v16 }
  0x24   : > { %447 = vrot.lane.b32.xlu1 %v430_v63, %s1745_s26  ;;  %327 = vst.msk [vmem:[#allocation3 + $0x20] sm:$0xff] %vm284_vm0, %v432_v2  ;;  %v1892_v5 = vld [vmem:[#allocation2 + $0x60] sm:$0xff]  ;;  %328 = vst.msk [vmem:[#allocation3 + $0x28] sm:$0xff] %vm284_vm0, %v433_v4  ;;  %v334_v8 = vld [vmem:[#allocation2 + $0x31] sm:$0xff] }
  0x25   : > { %445 = vrot.lane.b32.xlu0 %v429_v60, %s1745_s26  ;;  %329 = vst.msk [vmem:[#allocation3 + $0x30] sm:$0xff] %vm284_vm0, %v1892_v5  ;;  %v383_v9 = vld [vmem:[#allocation2 + $0x32] sm:$0xff]  ;;  %v481_v17 = vld [vmem:[#allocation2 + $0x41] sm:$0xff] }
  0x26   : > { %1646 = vmatpush3.msk.msra.mxu0 %vm769_vm2, %v736_v16  ;;  %v384_v18 = vld [vmem:[#allocation2 + $0x42] sm:$0xff]  ;;  %v336_v19 = vld [vmem:[#allocation2 + $0x51] sm:$0xff]  ;;  %901 = vst.msk [vmem:[#allocation4 + $0x68] sm:$0x3] %vm888_vm13, %v1742_v0  ;;  %903 = vst.msk [vmem:[#allocation4 + $0x78] sm:$0x3] %vm888_vm13, %v1742_v0 }
  0x27   : > { %v1899_v6 = vld [vmem:[#allocation2 + $0x70] sm:$0xff]  ;;  %v483_v21 = vld [vmem:[#allocation2 + $0x61] sm:$0xff]  ;;  %902 = vst.msk [vmem:[#allocation4 + $0x70] sm:$0xff] %vm886_vm12, %v1742_v0  ;;  %904 = vst.msk [vmem:[#allocation4 + $0x80] sm:$0xff] %vm886_vm12, %v1742_v0  ;;  %vm1169_vm2 = vcmask 392512  }
  0x28   : > { %351 = vrot.lane.b32.xlu1 %v333_v3, %s1743_s24  ;;  %330 = vst.msk [vmem:[#allocation3 + $0x38] sm:$0xff] %vm284_vm0, %v1899_v6  ;;  %v385_v20 = vld [vmem:[#allocation2 + $0x52] sm:$0xff]  ;;  %v532_v23 = vld [vmem:[#allocation2 + $0x62] sm:$0xff]  ;;  %vm1071_vm0 = vcmask 261312  }
  0x29   : > { %494 = vrot.lane.b32.xlu0 %v332_v59, %s1746_s27  ;;  %v338_v22 = vld [vmem:[#allocation2 + $0x71] sm:$0xff]  ;;  %v436_v25 = vld [vmem:[#allocation2 + $0x80] sm:$0xff]  ;;  %905 = vst.msk [vmem:[#allocation4 + $0x88] sm:$0x3] %vm888_vm13, %v1742_v0  ;;  %907 = vst.msk [vmem:[#allocation4 + $0x98] sm:$0x3] %vm888_vm13, %v1742_v0 }
  0x2a   : > { %v387_v24 = vld [vmem:[#allocation2 + $0x72] sm:$0xff]  ;;  %v485_v26 = vld [vmem:[#allocation2 + $0x81] sm:$0xff]  ;;  %906 = vst.msk [vmem:[#allocation4 + $0x90] sm:$0xff] %vm886_vm12, %v1742_v0 }
  0x2b   : > { %v534_v29 = vld [vmem:[#allocation2 + $0x82] sm:$0xff]  ;;  %v682_v34 = vld [vmem:[#allocation2 + $0x92] sm:$0xff] }
  0x2c   : > { %543 = vrot.lane.b32.xlu1 %v381_v58, %s1747_s28 }
  0x2d   : > { %496 = vrot.lane.b32.xlu0 %v333_v3, %s1746_s27 }
  0x30   : > { %400 = vrot.lane.b32.xlu1 %v382_v7, %s1744_s25 }
  0x31   : > { %353 = vrot.lane.b32.xlu0 %v334_v8, %s1743_s24 }
  0x34   : > { %593 = vrot.lane.b32.xlu1 %v430_v63, %s1748_s29 }
  0x35   : > { %545 = vrot.lane.b32.xlu0 %v382_v7, %s1747_s28 }
  0x38   : > { %449 = vrot.lane.b32.xlu1 %v431_v1, %s1745_s26 }
  0x39   : > { %402 = vrot.lane.b32.xlu0 %v383_v9, %s1744_s25 }
  0x3c   : > { %642 = vrot.lane.b32.xlu1 %v333_v3, %s1749_s9 }
  0x3d   : > { %595 = vrot.lane.b32.xlu0 %v431_v1, %s1748_s29 }
  0x40   : > { %498 = vrot.lane.b32.xlu1 %v334_v8, %s1746_s27 }
  0x41   : > { %451 = vrot.lane.b32.xlu0 %v432_v2, %s1745_s26 }
  0x44   : > { %691 = vrot.lane.b32.xlu1 %v382_v7, %s1750_s16 }
  0x45   : > { %644 = vrot.lane.b32.xlu0 %v334_v8, %s1749_s9 }
  0x48   : > { %500 = vrot.lane.b32.xlu1 %v481_v17, %s1746_s27 }
  0x49   : > { %355 = vrot.lane.b32.xlu0 %v481_v17, %s1743_s24 }
  0x4c   : > { %693 = vrot.lane.b32.xlu1 %v383_v9, %s1750_s16 }
  0x4d   : > { %547 = vrot.lane.b32.xlu0 %v383_v9, %s1747_s28 }
  0x50   : > { %404 = vrot.lane.b32.xlu1 %v384_v18, %s1744_s25 }
  0x51   : > { %357 = vrot.lane.b32.xlu0 %v336_v19, %s1743_s24 }
  0x54   : > { %597 = vrot.lane.b32.xlu1 %v432_v2, %s1748_s29 }
  0x55   : > { %549 = vrot.lane.b32.xlu0 %v384_v18, %s1747_s28 }
  0x58   : > { %453 = vrot.lane.b32.xlu1 %v433_v4, %s1745_s26 }
  0x59   : > { %406 = vrot.lane.b32.xlu0 %v385_v20, %s1744_s25 }
  0x5c   : > { %646 = vrot.lane.b32.xlu1 %v481_v17, %s1749_s9 }
  0x5d   : > { %599 = vrot.lane.b32.xlu0 %v433_v4, %s1748_s29 }
  0x60   : > { %502 = vrot.lane.b32.xlu1 %v336_v19, %s1746_s27 }
  0x61   : > { %455 = vrot.lane.b32.xlu0 %v1892_v5, %s1745_s26 }
  0x64   : > { %695 = vrot.lane.b32.xlu1 %v384_v18, %s1750_s16 }
  0x65   : > { %648 = vrot.lane.b32.xlu0 %v336_v19, %s1749_s9 }
  0x68   : > { %504 = vrot.lane.b32.xlu1 %v483_v21, %s1746_s27 }
  0x69   : > { %359 = vrot.lane.b32.xlu0 %v483_v21, %s1743_s24 }
  0x6c   : > { %697 = vrot.lane.b32.xlu1 %v385_v20, %s1750_s16 }
  0x6d   : > { %551 = vrot.lane.b32.xlu0 %v385_v20, %s1747_s28 }
  0x70   : > { %408 = vrot.lane.b32.xlu1 %v532_v23, %s1744_s25 }
  0x71   : > { %361 = vrot.lane.b32.xlu0 %v338_v22, %s1743_s24  ;;  %s1754_s24 = smov 64  }
  0x74   : > { %601 = vrot.lane.b32.xlu1 %v1892_v5, %s1748_s29 }
  0x75   : > { %553 = vrot.lane.b32.xlu0 %v532_v23, %s1747_s28 }
  0x78   : > { %457 = vrot.lane.b32.xlu1 %v1899_v6, %s1745_s26 }
  0x79   : > { %410 = vrot.lane.b32.xlu0 %v387_v24, %s1744_s25 }
  0x7c   : > { %650 = vrot.lane.b32.xlu1 %v483_v21, %s1749_s9 }
  0x7d   : > { %603 = vrot.lane.b32.xlu0 %v1899_v6, %s1748_s29 }
  0x80   : > { %506 = vrot.lane.b32.xlu1 %v338_v22, %s1746_s27 }
  0x81   : > { %459 = vrot.lane.b32.xlu0 %v436_v25, %s1745_s26  ;;  %v348_v27 = vpop.permute.xlu0 %347 }
  0x82   : > { %v397_v28 = vpop.permute.xlu1 %396  ;;  %372 = vst.msk [vmem:[#allocation3] sm:$0xff] %vm371_vm3, %v348_v27 }
  0x83   : > { %421 = vst.msk [vmem:[#allocation3] sm:$0xff] %vm420_vm4, %v397_v28 }
  0x84   : > { %699 = vrot.lane.b32.xlu1 %v532_v23, %s1750_s16 }
  0x85   : > { %652 = vrot.lane.b32.xlu0 %v338_v22, %s1749_s9 }
  0x88   : > { %555 = vrot.lane.b32.xlu1 %v387_v24, %s1747_s28 }
  0x89   : > { %508 = vrot.lane.b32.xlu0 %v485_v26, %s1746_s27 }
  0x8c   : > { %557 = vrot.lane.b32.xlu1 %v534_v29, %s1747_s28 }
  0x8d   : > { %701 = vrot.lane.b32.xlu0 %v387_v24, %s1750_s16 }
  0x90   : > { %607 = vrot.lane.b32.xlu1 %v584_v30, %s1748_s29 }
  0x91   : > { %605 = vrot.lane.b32.xlu0 %v436_v25, %s1748_s29 }
  0x92   : > { %v399_v32 = vpop.permute.xlu1 %398 }
  0x93   : > { %v350_v33 = vpop.permute.xlu0 %349 }
  0x94   : > { %373 = vst.msk [vmem:[#allocation3 + $0x8] sm:$0xff] %vm371_vm3, %v350_v33  ;;  %656 = vrot.lane.b32.xlu1 %v633_v31, %s1749_s9 }
  0x95   : > { %422 = vst.msk [vmem:[#allocation3 + $0x8] sm:$0xff] %vm420_vm4, %v399_v32  ;;  %654 = vrot.lane.b32.xlu0 %v485_v26, %s1749_s9 }
  0x96   : > { %v448_v35 = vpop.permute.xlu1 %447 }
  0x97   : > { %v446_v36 = vpop.permute.xlu0 %445  ;;  %471 = vst.msk [vmem:[#allocation3 + $0x8] sm:$0xff] %vm469_vm5, %v448_v35 }
  0x98   : > { %470 = vst.msk [vmem:[#allocation3] sm:$0xff] %vm469_vm5, %v446_v36  ;;  %705 = vrot.lane.b32.xlu1 %v682_v34, %s1750_s16 }
  0x99   : > { %703 = vrot.lane.b32.xlu0 %v534_v29, %s1750_s16 }
  0x9a   : > { %v352_v37 = vpop.permute.xlu1 %351 }
  0x9b   : > { %v495_v38 = vpop.permute.xlu0 %494  ;;  %374 = vst.msk [vmem:[#allocation3 + $0x10] sm:$0xff] %vm371_vm3, %v352_v37 }
  0x9c   : > { %519 = vst.msk [vmem:[#allocation3] sm:$0xff] %vm518_vm6, %v495_v38 }
  0x9e   : > { %v544_v39 = vpop.permute.xlu1 %543 }
  0x9f   : > { %v497_v40 = vpop.permute.xlu0 %496  ;;  %568 = vst.msk [vmem:[#allocation3] sm:$0xff] %vm567_vm7, %v544_v39 }
  0xa0   : > { %520 = vst.msk [vmem:[#allocation3 + $0x8] sm:$0xff] %vm518_vm6, %v497_v40  ;;  %v1186_v40 = vld [vmem:[#allocation4 + $0x90] sm:$0xff] }
  0xa1   : > { %1209 = vrot.lane.b32.xlu1 %v1186_v40, %s1751_s17 }
  0xa2   : > { %v401_v41 = vpop.permute.xlu1 %400 }
  0xa3   : > { %v354_v42 = vpop.permute.xlu0 %353  ;;  %423 = vst.msk [vmem:[#allocation3 + $0x10] sm:$0xff] %vm420_vm4, %v401_v41  ;;  %v933_v41 = vld [vmem:[#allocation4 + $0x1] sm:$0xff] }
  0xa4   : > { %375 = vst.msk [vmem:[#allocation3 + $0x18] sm:$0xff] %vm371_vm3, %v354_v42  ;;  %949 = vrot.lane.b32.xlu0 %v933_v41, %s1744_s25  ;;  %v1235_v42 = vld [vmem:[#allocation4 + $0x91] sm:$0xff] }
  0xa5   : > { %1258 = vrot.lane.b32.xlu1 %v1235_v42, %s1752_s20 }
  0xa6   : > { %v594_v43 = vpop.permute.xlu1 %593 }
  0xa7   : > { %v546_v44 = vpop.permute.xlu0 %545  ;;  %618 = vst.msk [vmem:[#allocation3] sm:$0xff] %vm617_vm8, %v594_v43  ;;  %v982_v43 = vld [vmem:[#allocation4 + $0x2] sm:$0xff] }
  0xa8   : > { %569 = vst.msk [vmem:[#allocation3 + $0x8] sm:$0xff] %vm567_vm7, %v546_v44  ;;  %998 = vrot.lane.b32.xlu0 %v982_v43, %s1746_s27  ;;  %v917_v44 = vld [vmem:[#allocation4] sm:$0xff] }
  0xa9   : > { %925 = vst.msk [vmem:[#allocation5] sm:$0xff] %vm886_vm12, %v917_v44 }
  0xaa   : > { %v450_v45 = vpop.permute.xlu1 %449 }
  0xab   : > { %v403_v46 = vpop.permute.xlu0 %402  ;;  %472 = vst.msk [vmem:[#allocation3 + $0x10] sm:$0xff] %vm469_vm5, %v450_v45 }
  0xac   : > { %424 = vst.msk [vmem:[#allocation3 + $0x18] sm:$0xff] %vm420_vm4, %v403_v46  ;;  %v2100_v46 = vld [vmem:[%s2300_s2] ss:$0 sm:$0xff] }
  0xae   : > { %v643_v47 = vpop.permute.xlu1 %642 }
  0xaf   : > { %v596_v48 = vpop.permute.xlu0 %595  ;;  %667 = vst.msk [vmem:[#allocation3] sm:$0xff] %vm666_vm9, %v643_v47 }
  0xb0   : > { %619 = vst.msk [vmem:[#allocation3 + $0x8] sm:$0xff] %vm617_vm8, %v596_v48 }
  0xb2   : > { %v499_v49 = vpop.permute.xlu1 %498 }
  0xb3   : > { %v452_v50 = vpop.permute.xlu0 %451  ;;  %521 = vst.msk [vmem:[#allocation3 + $0x10] sm:$0xff] %vm518_vm6, %v499_v49 }
  0xb4   : > { %473 = vst.msk [vmem:[#allocation3 + $0x18] sm:$0xff] %vm469_vm5, %v452_v50 }
  0xb6   : > { %v692_v51 = vpop.permute.xlu1 %691 }
  0xb7   : > { %v645_v52 = vpop.permute.xlu0 %644  ;;  %716 = vst.msk [vmem:[#allocation3] sm:$0xff] %vm715_vm10, %v692_v51 }
  0xb8   : > { %668 = vst.msk [vmem:[#allocation3 + $0x8] sm:$0xff] %vm666_vm9, %v645_v52 }
  0xba   : > { %v501_v53 = vpop.permute.xlu1 %500 }
  0xbb   : > { %v356_v54 = vpop.permute.xlu0 %355  ;;  %522 = vst.msk [vmem:[#allocation3 + $0x18] sm:$0xff] %vm518_vm6, %v501_v53 }
  0xbc   : > { %376 = vst.msk [vmem:[#allocation3 + $0x20] sm:$0xff] %vm371_vm3, %v356_v54 }
  0xbe   : > { %v694_v55 = vpop.permute.xlu1 %693  ;;  %v724_v57 = vld [vmem:[#allocation3] sm:$0xff] }
  0xbf   : > { %v548_v56 = vpop.permute.xlu0 %547  ;;  %717 = vst.msk [vmem:[#allocation3 + $0x8] sm:$0xff] %vm715_vm10, %v694_v55  ;;  %1647 = vmatprep.mubr.msk.f32.mxu0 %vm744_vm11, %v724_v57 }
  0xc0   : > { %570 = vst.msk [vmem:[#allocation3 + $0x10] sm:$0xff] %vm567_vm7, %v548_v56 }
  0xc2   : > { %v405_v58 = vpop.permute.xlu1 %404 }
  0xc3   : > { %v358_v59 = vpop.permute.xlu0 %357  ;;  %425 = vst.msk [vmem:[#allocation3 + $0x20] sm:$0xff] %vm420_vm4, %v405_v58 }
  0xc4   : > { %377 = vst.msk [vmem:[#allocation3 + $0x28] sm:$0xff] %vm371_vm3, %v358_v59 }
  0xc6   : > { %v598_v60 = vpop.permute.xlu1 %597  ;;  %v725_v62 = vld [vmem:[#allocation3 + $0x8] sm:$0xff] }
  0xc7   : > { %v550_v61 = vpop.permute.xlu0 %549  ;;  %620 = vst.msk [vmem:[#allocation3 + $0x10] sm:$0xff] %vm617_vm8, %v598_v60  ;;  %1648 = vmatmul.mubr.msk.f32.vlgmr.msra.gmra.mrb[0].mxu0 %vm744_vm11, %v725_v62 }
  0xc8   : > { %571 = vst.msk [vmem:[#allocation3 + $0x18] sm:$0xff] %vm567_vm7, %v550_v61 }
  0xca   : > { %v454_v63 = vpop.permute.xlu1 %453 }
  0xcb   : > { %v407_v1 = vpop.permute.xlu0 %406  ;;  %474 = vst.msk [vmem:[#allocation3 + $0x20] sm:$0xff] %vm469_vm5, %v454_v63 }
  0xcc   : > { %426 = vst.msk [vmem:[#allocation3 + $0x28] sm:$0xff] %vm420_vm4, %v407_v1 }
  0xce   : > { %v647_v2 = vpop.permute.xlu1 %646 }
  0xcf   : > { %v600_v3 = vpop.permute.xlu0 %599  ;;  %669 = vst.msk [vmem:[#allocation3 + $0x10] sm:$0xff] %vm666_vm9, %v647_v2 }
  0xd0   : > { %621 = vst.msk [vmem:[#allocation3 + $0x18] sm:$0xff] %vm617_vm8, %v600_v3 }
  0xd2   : > { %v503_v4 = vpop.permute.xlu1 %502 }
  0xd3   : > { %v456_v5 = vpop.permute.xlu0 %455  ;;  %523 = vst.msk [vmem:[#allocation3 + $0x20] sm:$0xff] %vm518_vm6, %v503_v4 }
  0xd4   : > { %475 = vst.msk [vmem:[#allocation3 + $0x28] sm:$0xff] %vm469_vm5, %v456_v5  ;;  %v1334_v5 = vld [vmem:[%s2301_s3] sm:$0xff] }
  0xd6   : > { %v696_v6 = vpop.permute.xlu1 %695 }
  0xd7   : > { %v649_v7 = vpop.permute.xlu0 %648  ;;  %718 = vst.msk [vmem:[#allocation3 + $0x10] sm:$0xff] %vm715_vm10, %v696_v6  ;;  %v1335_v6 = vld [vmem:[%s2301_s3 + $0x8] sm:$0xff] }
  0xd8   : > { %670 = vst.msk [vmem:[#allocation3 + $0x18] sm:$0xff] %vm666_vm9, %v649_v7 }
  0xda   : > { %v505_v8 = vpop.permute.xlu1 %504 }
  0xdb   : > { %v360_v9 = vpop.permute.xlu0 %359  ;;  %524 = vst.msk [vmem:[#allocation3 + $0x28] sm:$0xff] %vm518_vm6, %v505_v8  ;;  %v1697_v8 = vpack.c.bf16 %v1335_v6, %v1334_v5 }
  0xdc   : > { %378 = vst.msk [vmem:[#allocation3 + $0x30] sm:$0xff] %vm371_vm3, %v360_v9  ;;  %v1336_v9 = vld [vmem:[%s2301_s3 + $0x10] sm:$0xff] }
  0xdd   : > { %1698 = vmatprep.subr.bf16.mxu1 %v1697_v8 }
  0xde   : > { %v698_v10 = vpop.permute.xlu1 %697  ;;  %v726_v12 = vld [vmem:[#allocation3 + $0x10] sm:$0xff]  ;;  %1700 = vmatpush3.bf16.msra.mxu1 %v1697_v8 }
  0xdf   : > { %v552_v11 = vpop.permute.xlu0 %551  ;;  %719 = vst.msk [vmem:[#allocation3 + $0x18] sm:$0xff] %vm715_vm10, %v698_v10  ;;  %1650 = vmatprep.mubr.msk.f32.mxu0 %vm744_vm11, %v726_v12  ;;  %v1337_v10 = vld [vmem:[%s2301_s3 + $0x18] sm:$0xff] }
  0xe0   : > { %572 = vst.msk [vmem:[#allocation3 + $0x20] sm:$0xff] %vm567_vm7, %v552_v11  ;;  %v1701_v12 = vpack.c.bf16 %v1337_v10, %v1336_v9 }
  0xe2   : > { %v409_v14 = vpop.permute.xlu1 %408  ;;  %1702 = vmatprep.subr.bf16.mxu1 %v1701_v12 }
  0xe3   : > { %v362_v13 = vpop.permute.xlu0 %361  ;;  %427 = vst.msk [vmem:[#allocation3 + $0x30] sm:$0xff] %vm420_vm4, %v409_v14  ;;  %1704 = vmatpush3.bf16.msra.mxu1 %v1701_v12  ;;  %v1339_v14 = vld [vmem:[%s2301_s3 + $0x28] sm:$0xff] }
  0xe4   : > { %379 = vst.msk [vmem:[#allocation3 + $0x38] sm:$0xff] %vm371_vm3, %v362_v13  ;;  %v1338_v13 = vld [vmem:[%s2301_s3 + $0x20] sm:$0xff]  ;;  %vm1219_vm3 = vcmask 458112  }
  0xe6   : > { %v727_v16 = vld [vmem:[#allocation3 + $0x18] sm:$0xff]  ;;  %v602_v17 = vpop.permute.xlu1 %601 }
  0xe7   : > { %v554_v15 = vpop.permute.xlu0 %553  ;;  %1651 = vmatmul.mubr.msk.f32.gmra.mrb[2].mxu0 %vm744_vm11, %v727_v16  ;;  %622 = vst.msk [vmem:[#allocation3 + $0x20] sm:$0xff] %vm617_vm8, %v602_v17  ;;  %v1705_v16 = vpack.c.bf16 %v1339_v14, %v1338_v13  ;;  %v1340_v17 = vld [vmem:[%s2301_s3 + $0x30] sm:$0xff] }
  0xe8   : > { %573 = vst.msk [vmem:[#allocation3 + $0x28] sm:$0xff] %vm567_vm7, %v554_v15 }
  0xe9   : > { %1706 = vmatprep.subr.bf16.mxu1 %v1705_v16 }
  0xea   : > { %v458_v19 = vpop.permute.xlu1 %457  ;;  %1708 = vmatpush3.bf16.msra.mxu1 %v1705_v16 }
  0xeb   : > { %v411_v18 = vpop.permute.xlu0 %410  ;;  %476 = vst.msk [vmem:[#allocation3 + $0x30] sm:$0xff] %vm469_vm5, %v458_v19 }
  0xec   : > { %428 = vst.msk [vmem:[#allocation3 + $0x38] sm:$0xff] %vm420_vm4, %v411_v18  ;;  %v1341_v18 = vld [vmem:[%s2301_s3 + $0x38] sm:$0xff]  ;;  %vm1268_vm4 = vcmask 523712  }
  0xee   : > { %v651_v21 = vpop.permute.xlu1 %650 }
  0xef   : > { %v604_v20 = vpop.permute.xlu0 %603  ;;  %671 = vst.msk [vmem:[#allocation3 + $0x20] sm:$0xff] %vm666_vm9, %v651_v21 }
  0xf0   : > { %623 = vst.msk [vmem:[#allocation3 + $0x28] sm:$0xff] %vm617_vm8, %v604_v20  ;;  %v1709_v20 = vpack.c.bf16 %v1341_v18, %v1340_v17 }
  0xf2   : > { %v507_v23 = vpop.permute.xlu1 %506  ;;  %1710 = vmatprep.subr.bf16.mxu1 %v1709_v20 }
  0xf3   : > { %v460_v22 = vpop.permute.xlu0 %459  ;;  %525 = vst.msk [vmem:[#allocation3 + $0x30] sm:$0xff] %vm518_vm6, %v507_v23  ;;  %1712 = vmatpush3.bf16.msra.mxu1 %v1709_v20 }
  0xf4   : > { %477 = vst.msk [vmem:[#allocation3 + $0x38] sm:$0xff] %vm469_vm5, %v460_v22  ;;  %vm1317_vm5 = vcmask 589312  }
  0xf6   : > { %v700_v25 = vpop.permute.xlu1 %699 }
  0xf7   : > { %v653_v24 = vpop.permute.xlu0 %652  ;;  %720 = vst.msk [vmem:[#allocation3 + $0x20] sm:$0xff] %vm715_vm10, %v700_v25 }
  0xf8   : > { %672 = vst.msk [vmem:[#allocation3 + $0x28] sm:$0xff] %vm666_vm9, %v653_v24 }
  0xfa   : > { %v556_v27 = vpop.permute.xlu1 %555 }
  0xfb   : > { %v509_v26 = vpop.permute.xlu0 %508  ;;  %574 = vst.msk [vmem:[#allocation3 + $0x30] sm:$0xff] %vm567_vm7, %v556_v27 }
  0xfc   : > { %526 = vst.msk [vmem:[#allocation3 + $0x38] sm:$0xff] %vm518_vm6, %v509_v26  ;;  %v1342_v26 = vld [vmem:[%s2301_s3 + $0x40] sm:$0xff]  ;;  %vm1350_vm6 = vcmask 588800  }
  0xfd   : > { %1675 = vmatprep.subr.mxu1 %v1342_v26 }
  0xfe   : > { %v728_v29 = vld [vmem:[#allocation3 + $0x20] sm:$0xff]  ;;  %v558_v30 = vpop.permute.xlu1 %557  ;;  %1676 = vmatpush3.msra.mxu1 %v1342_v26 }
  0xff   : > { %v702_v28 = vpop.permute.xlu0 %701  ;;  %1653 = vmatprep.mubr.msk.f32.mxu0 %vm744_vm11, %v728_v29  ;;  %575 = vst.msk [vmem:[#allocation3 + $0x38] sm:$0xff] %vm567_vm7, %v558_v30 }
 0x100   : > { %721 = vst.msk [vmem:[#allocation3 + $0x28] sm:$0xff] %vm715_vm10, %v702_v28 }
 0x102   : > { %v608_v32 = vpop.permute.xlu1 %607 }
 0x103   : > { %v606_v31 = vpop.permute.xlu0 %605  ;;  %625 = vst.msk [vmem:[#allocation3 + $0x38] sm:$0xff] %vm617_vm8, %v608_v32 }
 0x104   : > { %624 = vst.msk [vmem:[#allocation3 + $0x30] sm:$0xff] %vm617_vm8, %v606_v31 }
 0x106   : > { %v657_v35 = vpop.permute.xlu1 %656 }
 0x107   : > { %v729_v33 = vld [vmem:[#allocation3 + $0x28] sm:$0xff]  ;;  %v655_v34 = vpop.permute.xlu0 %654  ;;  %674 = vst.msk [vmem:[#allocation3 + $0x38] sm:$0xff] %vm666_vm9, %v657_v35 }
 0x108   : > { %1654 = vmatmul.mubr.msk.f32.gmra.mrb[4].mxu0 %vm744_vm11, %v729_v33  ;;  %673 = vst.msk [vmem:[#allocation3 + $0x30] sm:$0xff] %vm666_vm9, %v655_v34 }
 0x10a   : > { %v706_v37 = vpop.permute.xlu1 %705 }
 0x10b   : > { %v704_v36 = vpop.permute.xlu0 %703  ;;  %723 = vst.msk [vmem:[#allocation3 + $0x38] sm:$0xff] %vm715_vm10, %v706_v37 }
 0x10c   : > { %722 = vst.msk [vmem:[#allocation3 + $0x30] sm:$0xff] %vm715_vm10, %v704_v36 }
 0x112   : > { %v731_v39 = vld [vmem:[#allocation3 + $0x38] sm:$0xff] }
 0x113   : > { %v730_v38 = vld [vmem:[#allocation3 + $0x30] sm:$0xff]  ;;  %v2200_v43 = vpop.permute.xlu1 %1209 }
 0x114   : > { %1656 = vmatprep.mubr.msk.f32.mxu0 %vm744_vm11, %v730_v38 }
 0x115   : > { %1657 = vmatmul.mubr.msk.f32.gmra.mrb[6].mxu0 %vm744_vm11, %v731_v39 }
 0x116   : > { %v950_v45 = vpop.permute.xlu0 %949 }
 0x117   : > { %974 = vst.msk [vmem:[#allocation5] sm:$0xff] %vm973_vm14, %v950_v45  ;;  %v2206_v45 = vpop.permute.xlu1 %1258 }
 0x11a   : > { %v999_v0 = vpop.permute.xlu0 %998 }
 0x11b   : > { %1023 = vst.msk [vmem:[#allocation5] sm:$0xff] %vm1022_vm15, %v999_v0 }
 0x19a   : > { %v1649_v47 = vpop.f32.mrb[0].mxu0 }
 0x19b   : > { %v845_v48 = vadd.f32 %v1649_v47, %v2100_v46  ;;  %v839_v49 = vpop.f32.mrb[1].mxu0 }
 0x19c   : > { %v840_v50 = vadd.f32 %v2100_v46, %v839_v49 }
 0x19d   : > { %v879_v51 = vmax.f32 %v845_v48, 0.0 }
 0x19e   : > { %v878_v52 = vmax.f32 %v840_v50, 0.0 }
 0x19f   : > { %910 = vst.msk [vmem:[#allocation4 + $0x21] sm:$0xff] %vm886_vm12, %v879_v51 }
 0x1a0   : > { %909 = vst.msk [vmem:[#allocation4 + $0x11] sm:$0xff] %vm886_vm12, %v878_v52 }
 0x1a6   : > { %v1081_v53 = vld [vmem:[#allocation4 + $0x21] sm:$0xff] }
 0x1a7   : > { %v1032_v54 = vld [vmem:[#allocation4 + $0x20] sm:$0xff]  ;;  %1098 = vrot.lane.b32.xlu0 %v1081_v53, %s1750_s16  ;;  %v1031_v55 = vld [vmem:[#allocation4 + $0x10] sm:$0xff] }
 0x1a8   : > { %1049 = vrot.lane.b32.xlu1 %v1032_v54, %s1748_s29  ;;  %927 = vst.msk [vmem:[#allocation5 + $0x10] sm:$0xff] %vm886_vm12, %v1032_v54  ;;  %926 = vst.msk [vmem:[#allocation5 + $0x8] sm:$0xff] %vm886_vm12, %v1031_v55  ;;  %v1130_v56 = vld [vmem:[#allocation4 + $0x22] sm:$0xff]  ;;  %v1080_v57 = vld [vmem:[#allocation4 + $0x11] sm:$0xff] }
 0x1a9   : > { %v983_v1 = vld [vmem:[#allocation4 + $0x12] sm:$0xff] }
 0x1ab   : > { %1147 = vrot.lane.b32.xlu0 %v1130_v56, %s1753_s23 }
 0x1ac   : > { %953 = vrot.lane.b32.xlu1 %v1081_v53, %s1744_s25 }
 0x1af   : > { %1047 = vrot.lane.b32.xlu0 %v1031_v55, %s1748_s29 }
 0x1b0   : > { %1002 = vrot.lane.b32.xlu1 %v1130_v56, %s1746_s27 }
 0x1b3   : > { %1096 = vrot.lane.b32.xlu0 %v1080_v57, %s1750_s16 }
 0x1b4   : > { %1195 = vrot.lane.b32.xlu1 %v1032_v54, %s1751_s17 }
 0x1b8   : > { %1244 = vrot.lane.b32.xlu1 %v1081_v53, %s1752_s20 }
 0x1ba   : > { %v1652_v58 = vpop.f32.mrb[2].mxu0 }
 0x1bb   : > { %v855_v59 = vadd.f32 %v1652_v58, %v2100_v46  ;;  %v849_v60 = vpop.f32.mrb[3].mxu0 }
 0x1bc   : > { %1293 = vrot.lane.b32.xlu1 %v1130_v56, %s1754_s24  ;;  %v850_v61 = vadd.f32 %v2100_v46, %v849_v60 }
 0x1bd   : > { %v881_v62 = vmax.f32 %v855_v59, 0.0 }
 0x1be   : > { %v880_v63 = vmax.f32 %v850_v61, 0.0 }
 0x1bf   : > { %912 = vst.msk [vmem:[#allocation4 + $0x41] sm:$0xff] %vm886_vm12, %v881_v62 }
 0x1c0   : > { %951 = vrot.lane.b32.xlu1 %v1080_v57, %s1744_s25  ;;  %911 = vst.msk [vmem:[#allocation4 + $0x31] sm:$0xff] %vm886_vm12, %v880_v63 }
 0x1c4   : > { %1000 = vrot.lane.b32.xlu1 %v983_v1, %s1746_s27 }
 0x1c6   : > { %v1034_v2 = vld [vmem:[#allocation4 + $0x40] sm:$0xff] }
 0x1c7   : > { %1053 = vrot.lane.b32.xlu0 %v1034_v2, %s1748_s29  ;;  %v1180_v3 = vld [vmem:[#allocation4 + $0x30] sm:$0xff]  ;;  %929 = vst.msk [vmem:[#allocation5 + $0x20] sm:$0xff] %vm886_vm12, %v1034_v2  ;;  %v937_v4 = vld [vmem:[#allocation4 + $0x41] sm:$0xff] }
 0x1c8   : > { %1145 = vrot.lane.b32.xlu1 %v983_v1, %s1753_s23  ;;  %928 = vst.msk [vmem:[#allocation5 + $0x18] sm:$0xff] %vm886_vm12, %v1180_v3  ;;  %v1132_v7 = vld [vmem:[#allocation4 + $0x42] sm:$0xff]  ;;  %v936_v11 = vld [vmem:[#allocation4 + $0x31] sm:$0xff] }
 0x1c9   : > { %v985_v15 = vld [vmem:[#allocation4 + $0x32] sm:$0xff] }
 0x1cb   : > { %957 = vrot.lane.b32.xlu0 %v937_v4, %s1744_s25 }
 0x1cc   : > { %1102 = vrot.lane.b32.xlu1 %v937_v4, %s1750_s16 }
 0x1cf   : > { %1151 = vrot.lane.b32.xlu0 %v1132_v7, %s1753_s23 }
 0x1d0   : > { %1006 = vrot.lane.b32.xlu1 %v1132_v7, %s1746_s27 }
 0x1d3   : > { %955 = vrot.lane.b32.xlu0 %v936_v11, %s1744_s25 }
 0x1d4   : > { %1199 = vrot.lane.b32.xlu1 %v1034_v2, %s1751_s17 }
 0x1d7   : > { %1004 = vrot.lane.b32.xlu0 %v985_v15, %s1746_s27 }
 0x1d8   : > { %1248 = vrot.lane.b32.xlu1 %v937_v4, %s1752_s20 }
 0x1db   : > { %v1655_v19 = vpop.f32.mrb[4].mxu0  ;;  %1197 = vrot.lane.b32.xlu0 %v1180_v3, %s1751_s17 }
 0x1dc   : > { %v865_v21 = vadd.f32 %v1655_v19, %v2100_v46  ;;  %v859_v22 = vpop.f32.mrb[5].mxu0  ;;  %1297 = vrot.lane.b32.xlu1 %v1132_v7, %s1754_s24 }
 0x1dd   : > { %v860_v23 = vadd.f32 %v2100_v46, %v859_v22 }
 0x1de   : > { %v883_v24 = vmax.f32 %v865_v21, 0.0 }
 0x1df   : > { %v882_v25 = vmax.f32 %v860_v23, 0.0  ;;  %1246 = vrot.lane.b32.xlu0 %v936_v11, %s1752_s20 }
 0x1e0   : > { %914 = vst.msk [vmem:[#allocation4 + $0x61] sm:$0xff] %vm886_vm12, %v883_v24  ;;  %1051 = vrot.lane.b32.xlu1 %v1180_v3, %s1748_s29 }
 0x1e1   : > { %913 = vst.msk [vmem:[#allocation4 + $0x51] sm:$0xff] %vm886_vm12, %v882_v25 }
 0x1e3   : > { %1149 = vrot.lane.b32.xlu0 %v985_v15, %s1753_s23 }
 0x1e4   : > { %1100 = vrot.lane.b32.xlu1 %v936_v11, %s1750_s16 }
 0x1e7   : > { %v1036_v27 = vld [vmem:[#allocation4 + $0x60] sm:$0xff] }
 0x1e8   : > { %1057 = vrot.lane.b32.xlu0 %v1036_v27, %s1748_s29  ;;  %1295 = vrot.lane.b32.xlu1 %v985_v15, %s1754_s24  ;;  %v1658_v28 = vpop.f32.mrb[6].mxu0  ;;  %v1182_v29 = vld [vmem:[#allocation4 + $0x50] sm:$0xff]  ;;  %931 = vst.msk [vmem:[#allocation5 + $0x30] sm:$0xff] %vm886_vm12, %v1036_v27  ;;  %v939_v33 = vld [vmem:[#allocation4 + $0x61] sm:$0xff] }
 0x1e9   : > { %v875_v30 = vadd.f32 %v1658_v28, %v2100_v46  ;;  %v869_v31 = vpop.f32.mrb[7].mxu0  ;;  %930 = vst.msk [vmem:[#allocation5 + $0x28] sm:$0xff] %vm886_vm12, %v1182_v29  ;;  %v1134_v36 = vld [vmem:[#allocation4 + $0x62] sm:$0xff]  ;;  %v938_v37 = vld [vmem:[#allocation4 + $0x51] sm:$0xff] }
 0x1ea   : > { %v870_v32 = vadd.f32 %v2100_v46, %v869_v31  ;;  %v987_v39 = vld [vmem:[#allocation4 + $0x52] sm:$0xff] }
 0x1eb   : > { %v885_v34 = vmax.f32 %v875_v30, 0.0  ;;  %v1284_v46 = vld [vmem:[#allocation4 + $0x92] sm:$0xff] }
 0x1ec   : > { %961 = vrot.lane.b32.xlu0 %v939_v33, %s1744_s25  ;;  %1106 = vrot.lane.b32.xlu1 %v939_v33, %s1750_s16  ;;  %v884_v35 = vmax.f32 %v870_v32, 0.0 }
 0x1ed   : > { %916 = vst.msk [vmem:[#allocation4 + $0x81] sm:$0xff] %vm886_vm12, %v885_v34 }
 0x1ee   : > { %915 = vst.msk [vmem:[#allocation4 + $0x71] sm:$0xff] %vm886_vm12, %v884_v35 }
 0x1f0   : > { %1155 = vrot.lane.b32.xlu0 %v1134_v36, %s1753_s23  ;;  %1010 = vrot.lane.b32.xlu1 %v1134_v36, %s1746_s27 }
 0x1f4   : > { %959 = vrot.lane.b32.xlu0 %v938_v37, %s1744_s25  ;;  %1203 = vrot.lane.b32.xlu1 %v1036_v27, %s1751_s17  ;;  %v1038_v40 = vld [vmem:[#allocation4 + $0x80] sm:$0xff] }
 0x1f5   : > { %v1037_v38 = vld [vmem:[#allocation4 + $0x70] sm:$0xff]  ;;  %v1087_v41 = vld [vmem:[#allocation4 + $0x81] sm:$0xff] }
 0x1f6   : > { %932 = vst.msk [vmem:[#allocation5 + $0x38] sm:$0xff] %vm886_vm12, %v1037_v38  ;;  %v1136_v42 = vld [vmem:[#allocation4 + $0x82] sm:$0xff]  ;;  %v1086_v44 = vld [vmem:[#allocation4 + $0x71] sm:$0xff] }
 0x1f7   : > { %v1135_v0 = vld [vmem:[#allocation4 + $0x72] sm:$0xff] }
 0x1f8   : > { %1008 = vrot.lane.b32.xlu0 %v987_v39, %s1746_s27  ;;  %1252 = vrot.lane.b32.xlu1 %v939_v33, %s1752_s20 }
 0x1fc   : > { %1201 = vrot.lane.b32.xlu0 %v1182_v29, %s1751_s17  ;;  %1301 = vrot.lane.b32.xlu1 %v1134_v36, %s1754_s24 }
 0x200   : > { %1250 = vrot.lane.b32.xlu0 %v938_v37, %s1752_s20  ;;  %1055 = vrot.lane.b32.xlu1 %v1182_v29, %s1748_s29 }
 0x204   : > { %1153 = vrot.lane.b32.xlu0 %v987_v39, %s1753_s23  ;;  %1104 = vrot.lane.b32.xlu1 %v938_v37, %s1750_s16 }
 0x208   : > { %1061 = vrot.lane.b32.xlu0 %v1038_v40, %s1748_s29  ;;  %1299 = vrot.lane.b32.xlu1 %v987_v39, %s1754_s24 }
 0x20c   : > { %1110 = vrot.lane.b32.xlu0 %v1087_v41, %s1750_s16  ;;  %1159 = vrot.lane.b32.xlu1 %v1136_v42, %s1753_s23 }
 0x210   : > { %1207 = vrot.lane.b32.xlu0 %v1038_v40, %s1751_s17  ;;  %1059 = vrot.lane.b32.xlu1 %v1037_v38, %s1748_s29  ;;  %s1606_s29 = sshll.u32 %s2305_s19, 6 }
 0x214   : > { %1256 = vrot.lane.b32.xlu0 %v1087_v41, %s1752_s20  ;;  %1108 = vrot.lane.b32.xlu1 %v1086_v44, %s1750_s16 }
 0x218   : > { %963 = vrot.lane.b32.xlu0 %v1086_v44, %s1744_s25  ;;  %1157 = vrot.lane.b32.xlu1 %v1135_v0, %s1753_s23 }
 0x219   : > { %v1099_v47 = vpop.permute.xlu0 %1098 }
 0x21a   : > { %v1050_v48 = vpop.permute.xlu1 %1049 }
 0x21c   : > { %1012 = vrot.lane.b32.xlu0 %v1135_v0, %s1746_s27  ;;  %1307 = vrot.lane.b32.xlu1 %v1284_v46, %s1754_s24 }
 0x21d   : > { %v1148_v49 = vpop.permute.xlu0 %1147 }
 0x21e   : > { %v954_v50 = vpop.permute.xlu1 %953 }
 0x21f   : > { %976 = vst.msk [vmem:[#allocation5 + $0x10] sm:$0xff] %vm973_vm14, %v954_v50 }
 0x220   : > { %1205 = vrot.lane.b32.xlu0 %v1037_v38, %s1751_s17 }
 0x221   : > { %v1048_v52 = vpop.permute.xlu0 %1047 }
 0x222   : > { %v1003_v51 = vpop.permute.xlu1 %1002  ;;  %1072 = vst.msk [vmem:[#allocation5] sm:$0xff] %vm1071_vm0, %v1048_v52 }
 0x223   : > { %1025 = vst.msk [vmem:[#allocation5 + $0x10] sm:$0xff] %vm1022_vm15, %v1003_v51 }
 0x224   : > { %1254 = vrot.lane.b32.xlu0 %v1086_v44, %s1752_s20  ;;  %s224_s20 = scalar_lea.vmem %s2303_s5, %s1606_s29 }
 0x225   : > { %v1097_v54 = vpop.permute.xlu0 %1096 }
 0x226   : > { %v1196_v53 = vpop.permute.xlu1 %1195  ;;  %1121 = vst.msk [vmem:[#allocation5] sm:$0xff] %vm1120_vm1, %v1097_v54 }
 0x228   : > { %1303 = vrot.lane.b32.xlu0 %v1135_v0, %s1754_s24 }
 0x22a   : > { %v1245_v55 = vpop.permute.xlu1 %1244 }
 0x22c   : > { %1305 = vrot.lane.b32.xlu0 %v1136_v42, %s1754_s24 }
 0x22e   : > { %v1294_v56 = vpop.permute.xlu1 %1293 }
 0x232   : > { %v952_v57 = vpop.permute.xlu1 %951 }
 0x233   : > { %975 = vst.msk [vmem:[#allocation5 + $0x8] sm:$0xff] %vm973_vm14, %v952_v57 }
 0x236   : > { %v1001_v58 = vpop.permute.xlu1 %1000 }
 0x237   : > { %1024 = vst.msk [vmem:[#allocation5 + $0x8] sm:$0xff] %vm1022_vm15, %v1001_v58 }
 0x238   : > { %1073 = vst.msk [vmem:[#allocation5 + $0x8] sm:$0xff] %vm1071_vm0, %v1050_v48 }
 0x239   : > { %1122 = vst.msk [vmem:[#allocation5 + $0x8] sm:$0xff] %vm1120_vm1, %v1099_v47  ;;  %v1054_v59 = vpop.permute.xlu0 %1053 }
 0x23a   : > { %v1146_v60 = vpop.permute.xlu1 %1145  ;;  %1171 = vst.msk [vmem:[#allocation5 + $0x8] sm:$0xff] %vm1169_vm2, %v1148_v49 }
 0x23b   : > { %1170 = vst.msk [vmem:[#allocation5] sm:$0xff] %vm1169_vm2, %v1146_v60 }
 0x23c   : > { %1220 = vst.msk [vmem:[#allocation5] sm:$0xff] %vm1219_vm3, %v1196_v53 }
 0x23d   : > { %1269 = vst.msk [vmem:[#allocation5] sm:$0xff] %vm1268_vm4, %v1245_v55  ;;  %v958_v61 = vpop.permute.xlu0 %957 }
 0x23e   : > { %1318 = vst.msk [vmem:[#allocation5] sm:$0xff] %vm1317_vm5, %v1294_v56  ;;  %v1103_v62 = vpop.permute.xlu1 %1102 }
 0x23f   : > { %978 = vst.msk [vmem:[#allocation5 + $0x20] sm:$0xff] %vm973_vm14, %v958_v61 }
 0x241   : > { %v1152_v63 = vpop.permute.xlu0 %1151 }
 0x242   : > { %v1007_v1 = vpop.permute.xlu1 %1006 }
 0x243   : > { %1027 = vst.msk [vmem:[#allocation5 + $0x20] sm:$0xff] %vm1022_vm15, %v1007_v1 }
 0x245   : > { %v1326_v2 = vld [vmem:[#allocation5] sm:$0xff]  ;;  %v956_v3 = vpop.permute.xlu0 %955 }
 0x246   : > { %1677 = vmatprep.mubr.msk.f32.mxu1 %vm1350_vm6, %v1326_v2  ;;  %v1200_v4 = vpop.permute.xlu1 %1199  ;;  %977 = vst.msk [vmem:[#allocation5 + $0x18] sm:$0xff] %vm973_vm14, %v956_v3 }
 0x249   : > { %v1005_v5 = vpop.permute.xlu0 %1004 }
 0x24a   : > { %v1249_v6 = vpop.permute.xlu1 %1248  ;;  %1026 = vst.msk [vmem:[#allocation5 + $0x18] sm:$0xff] %vm1022_vm15, %v1005_v5 }
 0x24b   : > { %1075 = vst.msk [vmem:[#allocation5 + $0x18] sm:$0xff] %vm1071_vm0, %v1054_v59 }
 0x24c   : > { %1124 = vst.msk [vmem:[#allocation5 + $0x18] sm:$0xff] %vm1120_vm1, %v1103_v62 }
 0x24d   : > { %1173 = vst.msk [vmem:[#allocation5 + $0x18] sm:$0xff] %vm1169_vm2, %v1152_v63  ;;  %v1198_v7 = vpop.permute.xlu0 %1197 }
 0x24e   : > { %v1298_v8 = vpop.permute.xlu1 %1297  ;;  %1221 = vst.msk [vmem:[#allocation5 + $0x8] sm:$0xff] %vm1219_vm3, %v1198_v7 }
 0x251   : > { %v1247_v9 = vpop.permute.xlu0 %1246 }
 0x252   : > { %v1052_v10 = vpop.permute.xlu1 %1051  ;;  %1270 = vst.msk [vmem:[#allocation5 + $0x8] sm:$0xff] %vm1268_vm4, %v1247_v9 }
 0x253   : > { %1074 = vst.msk [vmem:[#allocation5 + $0x10] sm:$0xff] %vm1071_vm0, %v1052_v10 }
 0x255   : > { %v1150_v11 = vpop.permute.xlu0 %1149 }
 0x256   : > { %v1101_v12 = vpop.permute.xlu1 %1100 }
 0x257   : > { %1123 = vst.msk [vmem:[#allocation5 + $0x10] sm:$0xff] %vm1120_vm1, %v1101_v12 }
 0x258   : > { %1172 = vst.msk [vmem:[#allocation5 + $0x10] sm:$0xff] %vm1169_vm2, %v1150_v11 }
 0x259   : > { %1222 = vst.msk [vmem:[#allocation5 + $0x10] sm:$0xff] %vm1219_vm3, %v1200_v4 }
 0x25a   : > { %1271 = vst.msk [vmem:[#allocation5 + $0x10] sm:$0xff] %vm1268_vm4, %v1249_v6  ;;  %v1058_v13 = vpop.permute.xlu0 %1057  ;;  %v1296_v14 = vpop.permute.xlu1 %1295 }
 0x25b   : > { %1320 = vst.msk [vmem:[#allocation5 + $0x10] sm:$0xff] %vm1317_vm5, %v1298_v8  ;;  %1319 = vst.msk [vmem:[#allocation5 + $0x8] sm:$0xff] %vm1317_vm5, %v1296_v14 }
 0x25e   : > { %v962_v15 = vpop.permute.xlu0 %961  ;;  %v1107_v16 = vpop.permute.xlu1 %1106 }
 0x25f   : > { %980 = vst.msk [vmem:[#allocation5 + $0x30] sm:$0xff] %vm973_vm14, %v962_v15 }
 0x262   : > { %v1156_v17 = vpop.permute.xlu0 %1155  ;;  %v1011_v18 = vpop.permute.xlu1 %1010  ;;  %v1327_v19 = vld [vmem:[#allocation5 + $0x8] sm:$0xff]  ;;  %v1328_v20 = vld [vmem:[#allocation5 + $0x10] sm:$0xff] }
 0x263   : > { %1029 = vst.msk [vmem:[#allocation5 + $0x30] sm:$0xff] %vm1022_vm15, %v1011_v18  ;;  %1678 = vmatmul.mubr.msk.f32.vlgmr.msra.gmra.mrb[0].mxu1 %vm1350_vm6, %v1327_v19 }
 0x264   : > { %1680 = vmatprep.mubr.msk.f32.mxu1 %vm1350_vm6, %v1328_v20 }
 0x266   : > { %v960_v21 = vpop.permute.xlu0 %959  ;;  %v1204_v22 = vpop.permute.xlu1 %1203 }
 0x267   : > { %979 = vst.msk [vmem:[#allocation5 + $0x28] sm:$0xff] %vm973_vm14, %v960_v21 }
 0x26a   : > { %v1009_v23 = vpop.permute.xlu0 %1008  ;;  %v1253_v24 = vpop.permute.xlu1 %1252 }
 0x26b   : > { %1028 = vst.msk [vmem:[#allocation5 + $0x28] sm:$0xff] %vm1022_vm15, %v1009_v23 }
 0x26c   : > { %1077 = vst.msk [vmem:[#allocation5 + $0x28] sm:$0xff] %vm1071_vm0, %v1058_v13 }
 0x26d   : > { %1126 = vst.msk [vmem:[#allocation5 + $0x28] sm:$0xff] %vm1120_vm1, %v1107_v16 }
 0x26e   : > { %1175 = vst.msk [vmem:[#allocation5 + $0x28] sm:$0xff] %vm1169_vm2, %v1156_v17  ;;  %v1202_v25 = vpop.permute.xlu0 %1201  ;;  %v1302_v26 = vpop.permute.xlu1 %1301 }
 0x26f   : > { %1223 = vst.msk [vmem:[#allocation5 + $0x18] sm:$0xff] %vm1219_vm3, %v1202_v25 }
 0x272   : > { %v1251_v27 = vpop.permute.xlu0 %1250  ;;  %v1056_v28 = vpop.permute.xlu1 %1055 }
 0x273   : > { %1272 = vst.msk [vmem:[#allocation5 + $0x18] sm:$0xff] %vm1268_vm4, %v1251_v27 }
 0x274   : > { %1076 = vst.msk [vmem:[#allocation5 + $0x20] sm:$0xff] %vm1071_vm0, %v1056_v28 }
 0x276   : > { %v1154_v29 = vpop.permute.xlu0 %1153  ;;  %v1105_v30 = vpop.permute.xlu1 %1104 }
 0x277   : > { %1125 = vst.msk [vmem:[#allocation5 + $0x20] sm:$0xff] %vm1120_vm1, %v1105_v30 }
 0x278   : > { %1174 = vst.msk [vmem:[#allocation5 + $0x20] sm:$0xff] %vm1169_vm2, %v1154_v29 }
 0x279   : > { %1224 = vst.msk [vmem:[#allocation5 + $0x20] sm:$0xff] %vm1219_vm3, %v1204_v22 }
 0x27a   : > { %1273 = vst.msk [vmem:[#allocation5 + $0x20] sm:$0xff] %vm1268_vm4, %v1253_v24  ;;  %v1062_v31 = vpop.permute.xlu0 %1061  ;;  %v1300_v32 = vpop.permute.xlu1 %1299 }
 0x27b   : > { %1322 = vst.msk [vmem:[#allocation5 + $0x20] sm:$0xff] %vm1317_vm5, %v1302_v26  ;;  %1321 = vst.msk [vmem:[#allocation5 + $0x18] sm:$0xff] %vm1317_vm5, %v1300_v32 }
 0x27e   : > { %v1111_v33 = vpop.permute.xlu0 %1110  ;;  %v1160_v34 = vpop.permute.xlu1 %1159 }
 0x282   : > { %v1208_v35 = vpop.permute.xlu0 %1207  ;;  %v1060_v36 = vpop.permute.xlu1 %1059  ;;  %v1329_v37 = vld [vmem:[#allocation5 + $0x18] sm:$0xff]  ;;  %v1330_v38 = vld [vmem:[#allocation5 + $0x20] sm:$0xff] }
 0x283   : > { %1078 = vst.msk [vmem:[#allocation5 + $0x30] sm:$0xff] %vm1071_vm0, %v1060_v36  ;;  %1681 = vmatmul.mubr.msk.f32.gmra.mrb[2].mxu1 %vm1350_vm6, %v1329_v37 }
 0x284   : > { %1683 = vmatprep.mubr.msk.f32.mxu1 %vm1350_vm6, %v1330_v38 }
 0x286   : > { %v1257_v39 = vpop.permute.xlu0 %1256  ;;  %v1109_v40 = vpop.permute.xlu1 %1108 }
 0x287   : > { %1127 = vst.msk [vmem:[#allocation5 + $0x30] sm:$0xff] %vm1120_vm1, %v1109_v40 }
 0x28a   : > { %v964_v41 = vpop.permute.xlu0 %963  ;;  %v1158_v42 = vpop.permute.xlu1 %1157 }
 0x28b   : > { %981 = vst.msk [vmem:[#allocation5 + $0x38] sm:$0xff] %vm973_vm14, %v964_v41 }
 0x28c   : > { %1176 = vst.msk [vmem:[#allocation5 + $0x30] sm:$0xff] %vm1169_vm2, %v1158_v42 }
 0x28d   : > { %1226 = vst.msk [vmem:[#allocation5 + $0x30] sm:$0xff] %vm1219_vm3, %v1208_v35 }
 0x28e   : > { %1275 = vst.msk [vmem:[#allocation5 + $0x30] sm:$0xff] %vm1268_vm4, %v1257_v39  ;;  %v1013_v44 = vpop.permute.xlu0 %1012  ;;  %v1308_v46 = vpop.permute.xlu1 %1307 }
 0x28f   : > { %1030 = vst.msk [vmem:[#allocation5 + $0x38] sm:$0xff] %vm1022_vm15, %v1013_v44 }
 0x290   : > { %1079 = vst.msk [vmem:[#allocation5 + $0x38] sm:$0xff] %vm1071_vm0, %v1062_v31 }
 0x291   : > { %1128 = vst.msk [vmem:[#allocation5 + $0x38] sm:$0xff] %vm1120_vm1, %v1111_v33 }
 0x292   : > { %1177 = vst.msk [vmem:[#allocation5 + $0x38] sm:$0xff] %vm1169_vm2, %v1160_v34  ;;  %v1206_v0 = vpop.permute.xlu0 %1205 }
 0x293   : > { %1225 = vst.msk [vmem:[#allocation5 + $0x28] sm:$0xff] %vm1219_vm3, %v1206_v0  ;;  %1227 = vst.msk [vmem:[#allocation5 + $0x38] sm:$0xff] %vm1219_vm3, %v2200_v43 }
 0x294   : > { %1276 = vst.msk [vmem:[#allocation5 + $0x38] sm:$0xff] %vm1268_vm4, %v2206_v45  ;;  %v1594_v45 = vld [vmem:[%s2302_s4] ss:$0 sm:$0xff] }
 0x295   : > { %1325 = vst.msk [vmem:[#allocation5 + $0x38] sm:$0xff] %vm1317_vm5, %v1308_v46 }
 0x296   : > { %v1255_v47 = vpop.permute.xlu0 %1254 }
 0x297   : > { %1274 = vst.msk [vmem:[#allocation5 + $0x28] sm:$0xff] %vm1268_vm4, %v1255_v47 }
 0x29a   : > { %v1304_v48 = vpop.permute.xlu0 %1303 }
 0x29b   : > { %1323 = vst.msk [vmem:[#allocation5 + $0x28] sm:$0xff] %vm1317_vm5, %v1304_v48 }
 0x29c   : > { %v1333_v51 = vld [vmem:[#allocation5 + $0x38] sm:$0xff] }
 0x29e   : > { %v1306_v49 = vpop.permute.xlu0 %1305 }
 0x29f   : > { %1324 = vst.msk [vmem:[#allocation5 + $0x30] sm:$0xff] %vm1317_vm5, %v1306_v49 }
 0x2a2   : > { %v1331_v50 = vld [vmem:[#allocation5 + $0x28] sm:$0xff] }
 0x2a3   : > { %1684 = vmatmul.mubr.msk.f32.gmra.mrb[4].mxu1 %vm1350_vm6, %v1331_v50 }
 0x2a6   : > { %v1332_v43 = vld [vmem:[#allocation5 + $0x30] sm:$0xff] }
 0x2a7   : > { %1686 = vmatprep.mubr.msk.f32.mxu1 %vm1350_vm6, %v1332_v43 }
 0x2a8   : > { %1687 = vmatmul.mubr.msk.f32.gmra.mrb[6].mxu1 %vm1350_vm6, %v1333_v51 }
 0x336   : > { %v1679_v52 = vpop.f32.mrb[0].mxu1 }
 0x337   : > { %v1447_v53 = vadd.f32 %v1679_v52, %v1594_v45  ;;  %v1441_v54 = vpop.f32.mrb[1].mxu1 }
 0x338   : > { %v1442_v55 = vadd.f32 %v1594_v45, %v1441_v54 }
 0x339   : > { %v1481_v56 = vmax.f32 %v1447_v53, 0.0 }
 0x33a   : > { %v1480_v57 = vmax.f32 %v1442_v55, 0.0 }
 0x33b   : > { %1489 = vst [vmem:[%s224_s20 + $0x8] sm:$0xff] %v1481_v56 }
 0x33c   : > { %1488 = vst [vmem:[%s224_s20] sm:$0xff] %v1480_v57 }
 0x356   : > { %v1682_v58 = vpop.f32.mrb[2].mxu1 }
 0x357   : > { %v1457_v59 = vadd.f32 %v1682_v58, %v1594_v45  ;;  %v1451_v60 = vpop.f32.mrb[3].mxu1 }
 0x358   : > { %v1452_v61 = vadd.f32 %v1594_v45, %v1451_v60 }
 0x359   : > { %v1483_v62 = vmax.f32 %v1457_v59, 0.0 }
 0x35a   : > { %v1482_v63 = vmax.f32 %v1452_v61, 0.0 }
 0x35b   : > { %1491 = vst [vmem:[%s224_s20 + $0x18] sm:$0xff] %v1483_v62 }
 0x35c   : > { %1490 = vst [vmem:[%s224_s20 + $0x10] sm:$0xff] %v1482_v63 }
 0x376   : > { %v1685_v1 = vpop.f32.mrb[4].mxu1 }
 0x377   : > { %v1467_v2 = vadd.f32 %v1685_v1, %v1594_v45  ;;  %v1461_v3 = vpop.f32.mrb[5].mxu1 }
 0x378   : > { %v1462_v4 = vadd.f32 %v1594_v45, %v1461_v3 }
 0x379   : > { %v1485_v5 = vmax.f32 %v1467_v2, 0.0 }
 0x37a   : > { %v1484_v6 = vmax.f32 %v1462_v4, 0.0 }
 0x37b   : > { %1493 = vst [vmem:[%s224_s20 + $0x28] sm:$0xff] %v1485_v5  ;;  %v1688_v7 = vpop.f32.mrb[6].mxu1 }
 0x37c   : > { %1492 = vst [vmem:[%s224_s20 + $0x20] sm:$0xff] %v1484_v6  ;;  %v1477_v8 = vadd.f32 %v1688_v7, %v1594_v45  ;;  %v1471_v9 = vpop.f32.mrb[7].mxu1 }
 0x37d   : > { %v1472_v10 = vadd.f32 %v1594_v45, %v1471_v9 }
 0x37e   : > { %v1487_v11 = vmax.f32 %v1477_v8, 0.0 }
 0x37f   : > { %v1486_v12 = vmax.f32 %v1472_v10, 0.0 }
 0x380   : > { %1495 = vst [vmem:[%s224_s20 + $0x38] sm:$0xff] %v1487_v11 }
 0x381   : > { %1494 = vst [vmem:[%s224_s20 + $0x30] sm:$0xff] %v1486_v12 }
 0x382 PF: > { %s15_s18 = sadd.s32 1, %s1740_s18  }
 0x383   : > { %p12_p4 = scmp.ge.s32.totalorder %s15_s18, 4  }
 0x385   :  { %14 = sbr.rel (!%p12_p4) target bundleno = 1 (0x1), region = 77 }

</bundles_post_ra>
